<compile_context>
chip_gen: v6e
topology: v6e:2x2x1
jax: 0.10.0
libtpu: 0.0.40
codegen_flags: <defaults>
</compile_context>

<pallas_src>
import functools

import jax
import jax.numpy as jnp
from jax.experimental import pallas as pl
from jax.experimental.pallas import tpu as pltpu

EPS = 1e-6


def _rmsnorm_ri(ar, ai, wr, wi):
    """Complex RMSNorm over the last axis; (wr, wi) is a complex weight (broadcasts)."""
    ms = jnp.mean(ar * ar + ai * ai, axis=-1, keepdims=True)
    inv = jax.lax.rsqrt(ms + EPS)
    nr = ar * inv
    ni = ai * inv
    return nr * wr - ni * wi, nr * wi + ni * wr


def attention_kernel(xr_ref, xi_ref, xs_ref,               # bf16 activations (1, N, C)
                     wr_ref, wi_ref, ws_ref,               # bf16 weights (C, 3C): Wr, Wi, Wr+Wi
                     br_ref, bi_ref,                        # f32 biases (1, 3C)
                     qnr_ref, qni_ref, knr_ref, kni_ref,    # RMSNorm weights (1, hd)
                     o_ref,                                 # (1, N, 2C) f32, lane-dense
                     *, num_heads, head_dim):
    H, hd = num_heads, head_dim
    xr = xr_ref[0]                       # (N, C) bf16
    xi = xi_ref[0]
    xs = xs_ref[0]                       # bf16(xr + xi), summed in f32 on host
    N = xr.shape[0]
    C = H * hd
    scale = float(hd) ** -0.5

    # ---------- complex QKV projection: Gauss 3-mult, bf16 in / f32 accumulate ----------
    m1 = jnp.dot(xr, wr_ref[...], preferred_element_type=jnp.float32)   # xr @ Wr
    m2 = jnp.dot(xi, wi_ref[...], preferred_element_type=jnp.float32)   # xi @ Wi
    m3 = jnp.dot(xs, ws_ref[...], preferred_element_type=jnp.float32)   # (xr+xi) @ (Wr+Wi)
    qkv_r = m1 - m2 + br_ref[...]          # (N, 3C)  real
    qkv_i = m3 - m1 - m2 + bi_ref[...]     # (N, 3C)  imag

    # ---------- split q/k/v; everything below is vectorized over ALL heads ----------
    def head_view(a, j):                   # (N, 3C) -> (N, H, hd) for the j-th of q/k/v
        return a[:, j * C:(j + 1) * C].reshape(N, H, hd)

    q_r, q_i = head_view(qkv_r, 0), head_view(qkv_i, 0)
    k_r, k_i = head_view(qkv_r, 1), head_view(qkv_i, 1)
    v_r, v_i = head_view(qkv_r, 2), head_view(qkv_i, 2)

    # Complex RMSNorm over hd, all heads at once ((1, hd) weights broadcast).
    q_r, q_i = _rmsnorm_ri(q_r, q_i, qnr_ref[...], qni_ref[...])
    k_r, k_i = _rmsnorm_ri(k_r, k_i, knr_ref[...], kni_ref[...])

    # Fold the softmax scale into q (cheaper than scaling the (N, N) scores).
    q_r = q_r * scale
    q_i = q_i * scale

    # Fuse real|imag along the contraction axis and batch over heads for the MXU.
    def to_hnd(ar, ai):                    # -> (H, N, 2*hd) bf16
        f = jnp.concatenate([ar, ai], axis=-1)            # (N, H, 2hd)
        return jnp.transpose(f, (1, 0, 2)).astype(jnp.bfloat16)

    qf = to_hnd(q_r, q_i)
    kf = to_hnd(k_r, k_i)
    vf = to_hnd(v_r, v_i)

    # Re(q @ conj(k)^T) == [qr|qi] @ [kr|ki]^T, batched over heads in one matmul.
    s = jnp.einsum("hnd,hmd->hnm", qf, kf,
                   preferred_element_type=jnp.float32)     # (H, N, N) f32

    # Softmax (f32 exp for v5e portability); denominator via EUP approx reciprocal.
    s = s - jnp.max(s, axis=-1, keepdims=True)
    p = jnp.exp(s)
    p = p * pl.reciprocal(jnp.sum(p, axis=-1, keepdims=True), approx=True)

    # p @ [vr | vi]: real and imag outputs in one batched matmul.
    out = jnp.einsum("hnm,hmd->hnd", p.astype(jnp.bfloat16), vf,
                     preferred_element_type=jnp.float32)   # (H, N, 2hd)

    # Lane-dense (N, 2C) output slab: [ real (head-major) | imag (head-major) ].
    out_nh = jnp.transpose(out, (1, 0, 2))                 # (N, H, 2hd)
    out_r = out_nh[:, :, :hd].reshape(N, C)
    out_i = out_nh[:, :, hd:].reshape(N, C)
    o_ref[0] = jnp.concatenate([out_r, out_i], axis=-1)


def attention_forward(xr, xi, params, *, num_heads):
    B, N, C = xr.shape
    hd = C // num_heads
    wr, wi, br, bi, qnr, qni, knr, kni = params

    # bf16 activations (halves/shrinks x DMA); the Gauss sum is added in f32 THEN cast.
    xr_b = xr.astype(jnp.bfloat16)
    xi_b = xi.astype(jnp.bfloat16)
    xs_b = (xr + xi).astype(jnp.bfloat16)

    # bf16 weights; Wr+Wi precomputed in f32 on host (bf16(wr+wi) != bf16(wr)+bf16(wi)).
    wr_b = wr.astype(jnp.bfloat16)
    wi_b = wi.astype(jnp.bfloat16)
    ws_b = (wr + wi).astype(jnp.bfloat16)
    weight_args = (wr_b, wi_b, ws_b, br, bi, qnr, qni, knr, kni)

    kernel = functools.partial(attention_kernel, num_heads=num_heads, head_dim=hd)

    x_spec = pl.BlockSpec((1, N, C), lambda b: (b, 0, 0))

    def const_spec(a):
        nd = a.ndim
        return pl.BlockSpec(a.shape, lambda b, _nd=nd: (0,) * _nd)

    weight_specs = [const_spec(a) for a in weight_args]
    out_spec = pl.BlockSpec((1, N, 2 * C), lambda b: (b, 0, 0))

    # ---------------- generation-adaptive VMEM budget ----------------
    bytes_w = sum(int(a.size) * a.dtype.itemsize for a in weight_args)
    x_block_bytes = 3 * N * C * 2                       # xr, xi, xs bf16 blocks
    out_block_bytes = N * 2 * C * 4                     # f32 output block
    io_bytes = 2 * (x_block_bytes + out_block_bytes + bytes_w)     # double-buffered
    tmp_bytes = (5 * N * 3 * C * 4                      # m1/m2/m3 + qkv_r/qkv_i (f32)
                 + 6 * num_heads * N * 2 * hd * 4       # q/k/v fused slabs (+ norm temps)
                 + 2 * num_heads * N * N * 4)           # scores + probs
    needed = io_bytes + tmp_bytes
    try:
        info = pltpu.get_tpu_info()
        vmem_cap = int(getattr(info, "vmem_capacity_bytes", 64 * 1024 * 1024))
    except Exception:
        vmem_cap = 64 * 1024 * 1024
    # Leave headroom for compiler-internal scratch: never more than 75% of physical VMEM
    # (~48 MiB on v7x, ~96 MiB on v5e/v6e); floor 16 MiB; 2x slack on the estimate.
    vmem_limit = int(min(int(0.75 * vmem_cap), max(16 * 1024 * 1024, 2 * needed)))

    # ---------------- cost estimate (helps XLA scheduling around the call) ----------------
    flops_proj = 3 * 2 * B * N * C * (3 * C)            # Gauss 3-mult complex GEMM
    flops_attn = 2 * 2 * B * num_heads * N * N * (2 * hd)
    cost = pl.CostEstimate(
        flops=flops_proj + flops_attn,
        transcendentals=B * num_heads * N * N + 4 * B * N * num_heads,
        bytes_accessed=3 * B * N * C * 2 + bytes_w + B * N * 2 * C * 4,
    )

    out = pl.pallas_call(
        kernel,
        out_shape=jax.ShapeDtypeStruct((B, N, 2 * C), jnp.float32),
        grid_spec=pltpu.PrefetchScalarGridSpec(
            num_scalar_prefetch=0,
            grid=(B,),
            in_specs=[x_spec, x_spec, x_spec] + weight_specs,
            out_specs=out_spec,
        ),
        compiler_params=pltpu.CompilerParams(
            dimension_semantics=("parallel",),
            vmem_limit_bytes=vmem_limit,
        ),
        cost_estimate=cost,
    )(xr_b, xi_b, xs_b, *weight_args)

    # Split the lane-dense slab back into real / imag (B, H, N, hd) planes (layout plumbing).
    out_r = out[..., :C].reshape(B, N, num_heads, hd).transpose(0, 2, 1, 3)
    out_i = out[..., C:].reshape(B, N, num_heads, hd).transpose(0, 2, 1, 3)
    return out_r, out_i


# ----------------------- pure-JAX f32 reference (module-faithful) -----------------------
def attention_reference(xr, xi, params, *, num_heads):
    wr, wi, br, bi, qnr, qni, knr, kni = params
    B, N, C = xr.shape
    hd = C // num_heads
    scale = float(hd) ** -0.5

    qkv_r = jnp.einsum("bnc,cm->bnm", xr, wr) - jnp.einsum("bnc,cm->bnm", xi, wi) + br
    qkv_i = jnp.einsum("bnc,cm->bnm", xr, wi) + jnp.einsum("bnc,cm->bnm", xi, wr) + bi
    # (B, N, 3C) -> (3, B, H, N, hd)  (matches reshape(B,N,3,H,hd).permute(2,0,3,1,4))
    qkv_r = qkv_r.reshape(B, N, 3, num_heads, hd).transpose(2, 0, 3, 1, 4)
    qkv_i = qkv_i.reshape(B, N, 3, num_heads, hd).transpose(2, 0, 3, 1, 4)
    q_r, k_r, v_r = qkv_r[0], qkv_r[1], qkv_r[2]
    q_i, k_i, v_i = qkv_i[0], qkv_i[1], qkv_i[2]

    q_r, q_i = _rmsnorm_ri(q_r, q_i, qnr.reshape(-1), qni.reshape(-1))
    k_r, k_i = _rmsnorm_ri(k_r, k_i, knr.reshape(-1), kni.reshape(-1))

    s = (jnp.einsum("bhnd,bhmd->bhnm", q_r, k_r)
         + jnp.einsum("bhnd,bhmd->bhnm", q_i, k_i)) * scale
    p = jax.nn.softmax(s, axis=-1)
    out_r = jnp.einsum("bhnm,bhmd->bhnd", p, v_r)
    out_i = jnp.einsum("bhnm,bhmd->bhnd", p, v_i)
    return out_r, out_i


def make_params(key, embed_dim, num_heads):
    hd = embed_dim // num_heads
    ks = jax.random.split(key, 4)
    s = 0.05
    wr = s * jax.random.normal(ks[0], (embed_dim, 3 * embed_dim), jnp.float32)
    wi = s * jax.random.normal(ks[1], (embed_dim, 3 * embed_dim), jnp.float32)
    br = s * jax.random.normal(ks[2], (1, 3 * embed_dim), jnp.float32)
    bi = s * jax.random.normal(ks[3], (1, 3 * embed_dim), jnp.float32)
    qn_r = jnp.ones((1, hd), jnp.float32)
    qn_i = jnp.zeros((1, hd), jnp.float32)
    kn_r = jnp.ones((1, hd), jnp.float32)
    kn_i = jnp.zeros((1, hd), jnp.float32)
    return (wr, wi, br, bi, qn_r, qn_i, kn_r, kn_i)


if __name__ == "__main__":
    B, N, embed_dim, num_heads = 2, 8, 32, 4

    key = jax.random.PRNGKey(0)
    kx, kp = jax.random.split(key)
    kxr, kxi = jax.random.split(kx)
    xr = jax.random.normal(kxr, (B, N, embed_dim), jnp.float32)
    xi = jax.random.normal(kxi, (B, N, embed_dim), jnp.float32)
    params = make_params(kp, embed_dim, num_heads)

    out_r, out_i = attention_forward(xr, xi, params, num_heads=num_heads)
    jax.block_until_ready((out_r, out_i))

    ref_r, ref_i = attention_reference(xr, xi, params, num_heads=num_heads)

    def rel_err(a, b):
        return float(jnp.linalg.norm(a - b) / (jnp.linalg.norm(b) + 1e-12))

    err_r = rel_err(out_r, ref_r)
    err_i = rel_err(out_i, ref_i)
    # Tolerance reflects bf16 MXU inputs (f32 accumulation) vs. the f32 reference.
    assert err_r < 3e-2, f"real part mismatch: rel err {err_r}"
    assert err_i < 3e-2, f"imag part mismatch: rel err {err_i}"

    print("KERNEL_OK")
</pallas_src>

<mosaic_0001>
module attributes {stable_mosaic.version = 11 : i64} {
  func.func @attention_kernel(%arg0: i32, %arg1: memref<1x8x32xbf16, #tpu.memory_space<vmem>>, %arg2: memref<1x8x32xbf16, #tpu.memory_space<vmem>>, %arg3: memref<1x8x32xbf16, #tpu.memory_space<vmem>>, %arg4: memref<32x96xbf16, #tpu.memory_space<vmem>>, %arg5: memref<32x96xbf16, #tpu.memory_space<vmem>>, %arg6: memref<32x96xbf16, #tpu.memory_space<vmem>>, %arg7: memref<1x96xf32, #tpu.memory_space<vmem>>, %arg8: memref<1x96xf32, #tpu.memory_space<vmem>>, %arg9: memref<1x8xf32, #tpu.memory_space<vmem>>, %arg10: memref<1x8xf32, #tpu.memory_space<vmem>>, %arg11: memref<1x8xf32, #tpu.memory_space<vmem>>, %arg12: memref<1x8xf32, #tpu.memory_space<vmem>>, %arg13: memref<1x8x64xf32, #tpu.memory_space<vmem>>) attributes {dimension_semantics = [#tpu.dimension_semantics<parallel>], iteration_bounds = array<i64: 2>, scalar_prefetch = 0 : i64, scratch_operands = 0 : i64, tpu.core_type = #tpu.core_type<tc>, window_params = [{transform_indices = @transform_0, window_bounds = array<i64: 1, 8, 32>}, {transform_indices = @transform_1, window_bounds = array<i64: 1, 8, 32>}, {transform_indices = @transform_2, window_bounds = array<i64: 1, 8, 32>}, {pipeline_mode = #tpu.pipeline_mode<synchronous>, transform_indices = @transform_3, window_bounds = array<i64: 32, 96>}, {pipeline_mode = #tpu.pipeline_mode<synchronous>, transform_indices = @transform_4, window_bounds = array<i64: 32, 96>}, {pipeline_mode = #tpu.pipeline_mode<synchronous>, transform_indices = @transform_5, window_bounds = array<i64: 32, 96>}, {pipeline_mode = #tpu.pipeline_mode<synchronous>, transform_indices = @transform_6, window_bounds = array<i64: 1, 96>}, {pipeline_mode = #tpu.pipeline_mode<synchronous>, transform_indices = @transform_7, window_bounds = array<i64: 1, 96>}, {pipeline_mode = #tpu.pipeline_mode<synchronous>, transform_indices = @transform_8, window_bounds = array<i64: 1, 8>}, {pipeline_mode = #tpu.pipeline_mode<synchronous>, transform_indices = @transform_9, window_bounds = array<i64: 1, 8>}, {pipeline_mode = #tpu.pipeline_mode<synchronous>, transform_indices = @transform_10, window_bounds = array<i64: 1, 8>}, {pipeline_mode = #tpu.pipeline_mode<synchronous>, transform_indices = @transform_11, window_bounds = array<i64: 1, 8>}, {transform_indices = @transform_12, window_bounds = array<i64: 1, 8, 64>}]} {
    %c0 = arith.constant 0 : index
    %c0_0 = arith.constant 0 : index
    %c0_1 = arith.constant 0 : index
    %0 = vector.load %arg1[%c0, %c0_0, %c0_1] : memref<1x8x32xbf16, #tpu.memory_space<vmem>>, vector<1x8x32xbf16>
    %1 = vector.shape_cast %0 : vector<1x8x32xbf16> to vector<8x32xbf16>
    %c0_2 = arith.constant 0 : index
    %c0_3 = arith.constant 0 : index
    %c0_4 = arith.constant 0 : index
    %2 = vector.load %arg2[%c0_2, %c0_3, %c0_4] : memref<1x8x32xbf16, #tpu.memory_space<vmem>>, vector<1x8x32xbf16>
    %3 = vector.shape_cast %2 : vector<1x8x32xbf16> to vector<8x32xbf16>
    %c0_5 = arith.constant 0 : index
    %c0_6 = arith.constant 0 : index
    %c0_7 = arith.constant 0 : index
    %4 = vector.load %arg3[%c0_5, %c0_6, %c0_7] : memref<1x8x32xbf16, #tpu.memory_space<vmem>>, vector<1x8x32xbf16>
    %5 = vector.shape_cast %4 : vector<1x8x32xbf16> to vector<8x32xbf16>
    %c0_8 = arith.constant 0 : index
    %c0_9 = arith.constant 0 : index
    %6 = vector.load %arg4[%c0_8, %c0_9] : memref<32x96xbf16, #tpu.memory_space<vmem>>, vector<32x96xbf16>
    %cst = arith.constant dense<0.000000e+00> : vector<8x96xf32>
    %7 = tpu.matmul %1, %6, %cst {dimension_numbers = #tpu.dot_dimension_numbers<[1], [0], [0], [1], [0, 0, 1, 1], [], []>} : vector<8x32xbf16>, vector<32x96xbf16>, vector<8x96xf32> -> vector<8x96xf32>
    %c0_10 = arith.constant 0 : index
    %c0_11 = arith.constant 0 : index
    %8 = vector.load %arg5[%c0_10, %c0_11] : memref<32x96xbf16, #tpu.memory_space<vmem>>, vector<32x96xbf16>
    %cst_12 = arith.constant dense<0.000000e+00> : vector<8x96xf32>
    %9 = tpu.matmul %3, %8, %cst_12 {dimension_numbers = #tpu.dot_dimension_numbers<[1], [0], [0], [1], [0, 0, 1, 1], [], []>} : vector<8x32xbf16>, vector<32x96xbf16>, vector<8x96xf32> -> vector<8x96xf32>
    %c0_13 = arith.constant 0 : index
    %c0_14 = arith.constant 0 : index
    %10 = vector.load %arg6[%c0_13, %c0_14] : memref<32x96xbf16, #tpu.memory_space<vmem>>, vector<32x96xbf16>
    %cst_15 = arith.constant dense<0.000000e+00> : vector<8x96xf32>
    %11 = tpu.matmul %5, %10, %cst_15 {dimension_numbers = #tpu.dot_dimension_numbers<[1], [0], [0], [1], [0, 0, 1, 1], [], []>} : vector<8x32xbf16>, vector<32x96xbf16>, vector<8x96xf32> -> vector<8x96xf32>
    %12 = arith.subf %7, %9 : vector<8x96xf32>
    %c0_16 = arith.constant 0 : index
    %c0_17 = arith.constant 0 : index
    %13 = vector.load %arg7[%c0_16, %c0_17] : memref<1x96xf32, #tpu.memory_space<vmem>>, vector<1x96xf32>
    %14 = vector.broadcast %13 : vector<1x96xf32> to vector<8x96xf32>
    %15 = arith.addf %12, %14 : vector<8x96xf32>
    %16 = arith.subf %11, %7 : vector<8x96xf32>
    %17 = arith.subf %16, %9 : vector<8x96xf32>
    %c0_18 = arith.constant 0 : index
    %c0_19 = arith.constant 0 : index
    %18 = vector.load %arg8[%c0_18, %c0_19] : memref<1x96xf32, #tpu.memory_space<vmem>>, vector<1x96xf32>
    %19 = vector.broadcast %18 : vector<1x96xf32> to vector<8x96xf32>
    %20 = arith.addf %17, %19 : vector<8x96xf32>
    %21 = vector.extract_strided_slice %15 {offsets = [0, 0], sizes = [8, 32], strides = [1, 1]} : vector<8x96xf32> to vector<8x32xf32>
    %22 = vector.shape_cast %21 : vector<8x32xf32> to vector<8x4x8xf32>
    %23 = vector.extract_strided_slice %20 {offsets = [0, 0], sizes = [8, 32], strides = [1, 1]} : vector<8x96xf32> to vector<8x32xf32>
    %24 = vector.shape_cast %23 : vector<8x32xf32> to vector<8x4x8xf32>
    %25 = vector.extract_strided_slice %15 {offsets = [0, 32], sizes = [8, 32], strides = [1, 1]} : vector<8x96xf32> to vector<8x32xf32>
    %26 = vector.shape_cast %25 : vector<8x32xf32> to vector<8x4x8xf32>
    %27 = vector.extract_strided_slice %20 {offsets = [0, 32], sizes = [8, 32], strides = [1, 1]} : vector<8x96xf32> to vector<8x32xf32>
    %28 = vector.shape_cast %27 : vector<8x32xf32> to vector<8x4x8xf32>
    %29 = vector.extract_strided_slice %15 {offsets = [0, 64], sizes = [8, 32], strides = [1, 1]} : vector<8x96xf32> to vector<8x32xf32>
    %30 = vector.shape_cast %29 : vector<8x32xf32> to vector<8x4x8xf32>
    %31 = vector.extract_strided_slice %20 {offsets = [0, 64], sizes = [8, 32], strides = [1, 1]} : vector<8x96xf32> to vector<8x32xf32>
    %32 = vector.shape_cast %31 : vector<8x32xf32> to vector<8x4x8xf32>
    %c0_20 = arith.constant 0 : index
    %c0_21 = arith.constant 0 : index
    %33 = vector.load %arg9[%c0_20, %c0_21] : memref<1x8xf32, #tpu.memory_space<vmem>>, vector<1x8xf32>
    %c0_22 = arith.constant 0 : index
    %c0_23 = arith.constant 0 : index
    %34 = vector.load %arg10[%c0_22, %c0_23] : memref<1x8xf32, #tpu.memory_space<vmem>>, vector<1x8xf32>
    %35 = arith.mulf %22, %22 : vector<8x4x8xf32>
    %36 = arith.mulf %24, %24 : vector<8x4x8xf32>
    %37 = arith.addf %35, %36 : vector<8x4x8xf32>
    %cst_24 = arith.constant dense<0.000000e+00> : vector<8x4xf32>
    %38 = vector.multi_reduction <add>, %37, %cst_24 [2] : vector<8x4x8xf32> to vector<8x4xf32>
    %39 = vector.shape_cast %38 : vector<8x4xf32> to vector<8x4x1xf32>
    %cst_25 = arith.constant 8.000000e+00 : f32
    %40 = vector.broadcast %cst_25 : f32 to vector<8x4x1xf32>
    %41 = arith.divf %39, %40 : vector<8x4x1xf32>
    %cst_26 = arith.constant 9.99999997E-7 : f32
    %42 = vector.broadcast %cst_26 : f32 to vector<8x4x1xf32>
    %43 = arith.addf %41, %42 : vector<8x4x1xf32>
    %44 = math.rsqrt %43 : vector<8x4x1xf32>
    %45 = vector.broadcast %44 : vector<8x4x1xf32> to vector<8x4x8xf32>
    %46 = arith.mulf %22, %45 : vector<8x4x8xf32>
    %47 = vector.broadcast %44 : vector<8x4x1xf32> to vector<8x4x8xf32>
    %48 = arith.mulf %24, %47 : vector<8x4x8xf32>
    %49 = vector.shape_cast %33 : vector<1x8xf32> to vector<1x1x8xf32>
    %50 = vector.broadcast %49 : vector<1x1x8xf32> to vector<8x4x8xf32>
    %51 = arith.mulf %46, %50 : vector<8x4x8xf32>
    %52 = vector.shape_cast %34 : vector<1x8xf32> to vector<1x1x8xf32>
    %53 = vector.broadcast %52 : vector<1x1x8xf32> to vector<8x4x8xf32>
    %54 = arith.mulf %48, %53 : vector<8x4x8xf32>
    %55 = arith.subf %51, %54 : vector<8x4x8xf32>
    %56 = vector.shape_cast %34 : vector<1x8xf32> to vector<1x1x8xf32>
    %57 = vector.broadcast %56 : vector<1x1x8xf32> to vector<8x4x8xf32>
    %58 = arith.mulf %46, %57 : vector<8x4x8xf32>
    %59 = vector.shape_cast %33 : vector<1x8xf32> to vector<1x1x8xf32>
    %60 = vector.broadcast %59 : vector<1x1x8xf32> to vector<8x4x8xf32>
    %61 = arith.mulf %48, %60 : vector<8x4x8xf32>
    %62 = arith.addf %58, %61 : vector<8x4x8xf32>
    %c0_27 = arith.constant 0 : index
    %c0_28 = arith.constant 0 : index
    %63 = vector.load %arg11[%c0_27, %c0_28] : memref<1x8xf32, #tpu.memory_space<vmem>>, vector<1x8xf32>
    %c0_29 = arith.constant 0 : index
    %c0_30 = arith.constant 0 : index
    %64 = vector.load %arg12[%c0_29, %c0_30] : memref<1x8xf32, #tpu.memory_space<vmem>>, vector<1x8xf32>
    %65 = arith.mulf %26, %26 : vector<8x4x8xf32>
    %66 = arith.mulf %28, %28 : vector<8x4x8xf32>
    %67 = arith.addf %65, %66 : vector<8x4x8xf32>
    %cst_31 = arith.constant dense<0.000000e+00> : vector<8x4xf32>
    %68 = vector.multi_reduction <add>, %67, %cst_31 [2] : vector<8x4x8xf32> to vector<8x4xf32>
    %69 = vector.shape_cast %68 : vector<8x4xf32> to vector<8x4x1xf32>
    %cst_32 = arith.constant 8.000000e+00 : f32
    %70 = vector.broadcast %cst_32 : f32 to vector<8x4x1xf32>
    %71 = arith.divf %69, %70 : vector<8x4x1xf32>
    %cst_33 = arith.constant 9.99999997E-7 : f32
    %72 = vector.broadcast %cst_33 : f32 to vector<8x4x1xf32>
    %73 = arith.addf %71, %72 : vector<8x4x1xf32>
    %74 = math.rsqrt %73 : vector<8x4x1xf32>
    %75 = vector.broadcast %74 : vector<8x4x1xf32> to vector<8x4x8xf32>
    %76 = arith.mulf %26, %75 : vector<8x4x8xf32>
    %77 = vector.broadcast %74 : vector<8x4x1xf32> to vector<8x4x8xf32>
    %78 = arith.mulf %28, %77 : vector<8x4x8xf32>
    %79 = vector.shape_cast %63 : vector<1x8xf32> to vector<1x1x8xf32>
    %80 = vector.broadcast %79 : vector<1x1x8xf32> to vector<8x4x8xf32>
    %81 = arith.mulf %76, %80 : vector<8x4x8xf32>
    %82 = vector.shape_cast %64 : vector<1x8xf32> to vector<1x1x8xf32>
    %83 = vector.broadcast %82 : vector<1x1x8xf32> to vector<8x4x8xf32>
    %84 = arith.mulf %78, %83 : vector<8x4x8xf32>
    %85 = arith.subf %81, %84 : vector<8x4x8xf32>
    %86 = vector.shape_cast %64 : vector<1x8xf32> to vector<1x1x8xf32>
    %87 = vector.broadcast %86 : vector<1x1x8xf32> to vector<8x4x8xf32>
    %88 = arith.mulf %76, %87 : vector<8x4x8xf32>
    %89 = vector.shape_cast %63 : vector<1x8xf32> to vector<1x1x8xf32>
    %90 = vector.broadcast %89 : vector<1x1x8xf32> to vector<8x4x8xf32>
    %91 = arith.mulf %78, %90 : vector<8x4x8xf32>
    %92 = arith.addf %88, %91 : vector<8x4x8xf32>
    %cst_34 = arith.constant 0.353553385 : f32
    %93 = vector.broadcast %cst_34 : f32 to vector<8x4x8xf32>
    %94 = arith.mulf %55, %93 : vector<8x4x8xf32>
    %cst_35 = arith.constant 0.353553385 : f32
    %95 = vector.broadcast %cst_35 : f32 to vector<8x4x8xf32>
    %96 = arith.mulf %62, %95 : vector<8x4x8xf32>
    %97 = tpu.concatenate %94, %96 in 2 : vector<8x4x8xf32>, vector<8x4x8xf32> -> vector<8x4x16xf32>
    %98 = tpu.transpose %97, [1, 0, 2] : vector<8x4x16xf32> -> vector<4x8x16xf32>
    %99 = arith.truncf %98 : vector<4x8x16xf32> to vector<4x8x16xbf16>
    %100 = tpu.concatenate %85, %92 in 2 : vector<8x4x8xf32>, vector<8x4x8xf32> -> vector<8x4x16xf32>
    %101 = tpu.transpose %100, [1, 0, 2] : vector<8x4x16xf32> -> vector<4x8x16xf32>
    %102 = arith.truncf %101 : vector<4x8x16xf32> to vector<4x8x16xbf16>
    %103 = tpu.concatenate %30, %32 in 2 : vector<8x4x8xf32>, vector<8x4x8xf32> -> vector<8x4x16xf32>
    %104 = tpu.transpose %103, [1, 0, 2] : vector<8x4x16xf32> -> vector<4x8x16xf32>
    %105 = arith.truncf %104 : vector<4x8x16xf32> to vector<4x8x16xbf16>
    "tpu.trace_start"() <{level = 10 : i32, message = "hnd,hmd->hnm"}> : () -> ()
    %cst_36 = arith.constant dense<0.000000e+00> : vector<4x8x8xf32>
    %106 = tpu.matmul %99, %102, %cst_36 {dimension_numbers = #tpu.dot_dimension_numbers<[2], [2], [1], [1], [0, 0, 0, 1, 1, 1], [0], [0]>} : vector<4x8x16xbf16>, vector<4x8x16xbf16>, vector<4x8x8xf32> -> vector<4x8x8xf32>
    "tpu.trace_stop"() : () -> ()
    %cst_37 = arith.constant dense<0xFF800000> : vector<4x8xf32>
    %107 = vector.multi_reduction <maximumf>, %106, %cst_37 [2] : vector<4x8x8xf32> to vector<4x8xf32>
    %108 = vector.shape_cast %107 : vector<4x8xf32> to vector<4x8x1xf32>
    %109 = vector.broadcast %108 : vector<4x8x1xf32> to vector<4x8x8xf32>
    %110 = arith.subf %106, %109 : vector<4x8x8xf32>
    %111 = math.exp %110 : vector<4x8x8xf32>
    %cst_38 = arith.constant dense<0.000000e+00> : vector<4x8xf32>
    %112 = vector.multi_reduction <add>, %111, %cst_38 [2] : vector<4x8x8xf32> to vector<4x8xf32>
    %113 = vector.shape_cast %112 : vector<4x8xf32> to vector<4x8x1xf32>
    %114 = tpu.reciprocal %113 {approx = true} : vector<4x8x1xf32> -> vector<4x8x1xf32>
    %115 = vector.broadcast %114 : vector<4x8x1xf32> to vector<4x8x8xf32>
    %116 = arith.mulf %111, %115 : vector<4x8x8xf32>
    %117 = arith.truncf %116 : vector<4x8x8xf32> to vector<4x8x8xbf16>
    "tpu.trace_start"() <{level = 10 : i32, message = "hnm,hmd->hnd"}> : () -> ()
    %cst_39 = arith.constant dense<0.000000e+00> : vector<4x8x16xf32>
    %118 = tpu.matmul %117, %105, %cst_39 {dimension_numbers = #tpu.dot_dimension_numbers<[2], [1], [1], [2], [0, 0, 0, 1, 1, 2], [0], [0]>} : vector<4x8x8xbf16>, vector<4x8x16xbf16>, vector<4x8x16xf32> -> vector<4x8x16xf32>
    "tpu.trace_stop"() : () -> ()
    %119 = tpu.transpose %118, [1, 0, 2] : vector<4x8x16xf32> -> vector<8x4x16xf32>
    %120 = vector.extract_strided_slice %119 {offsets = [0, 0, 0], sizes = [8, 4, 8], strides = [1, 1, 1]} : vector<8x4x16xf32> to vector<8x4x8xf32>
    %121 = vector.shape_cast %120 : vector<8x4x8xf32> to vector<8x32xf32>
    %122 = vector.extract_strided_slice %119 {offsets = [0, 0, 8], sizes = [8, 4, 8], strides = [1, 1, 1]} : vector<8x4x16xf32> to vector<8x4x8xf32>
    %123 = vector.shape_cast %122 : vector<8x4x8xf32> to vector<8x32xf32>
    %124 = tpu.concatenate %121, %123 in 1 : vector<8x32xf32>, vector<8x32xf32> -> vector<8x64xf32>
    %c0_40 = arith.constant 0 : index
    %c0_41 = arith.constant 0 : index
    %c0_42 = arith.constant 0 : index
    %125 = vector.load %arg13[%c0_40, %c0_41, %c0_42] : memref<1x8x64xf32, #tpu.memory_space<vmem>>, vector<1x8x64xf32>
    %126 = vector.shape_cast %125 : vector<1x8x64xf32> to vector<8x64xf32>
    %127 = vector.shape_cast %124 : vector<8x64xf32> to vector<1x8x64xf32>
    tpu.vector_store %arg13[%c0_40, %c0_41, %c0_42], %127 {strides = array<i32>} : memref<1x8x64xf32, #tpu.memory_space<vmem>>, vector<1x8x64xf32>,
    return
  }
  func.func @transform_0(%arg0: i32) -> (i32, i32, i32) {
    %c0_i32 = arith.constant 0 : i32
    %c0_i32_0 = arith.constant 0 : i32
    %c0_i32_1 = arith.constant 0 : i32
    return %arg0, %c0_i32, %c0_i32_0 : i32, i32, i32
  }
  func.func @transform_1(%arg0: i32) -> (i32, i32, i32) {
    %c0_i32 = arith.constant 0 : i32
    %c0_i32_0 = arith.constant 0 : i32
    %c0_i32_1 = arith.constant 0 : i32
    return %arg0, %c0_i32, %c0_i32_0 : i32, i32, i32
  }
  func.func @transform_2(%arg0: i32) -> (i32, i32, i32) {
    %c0_i32 = arith.constant 0 : i32
    %c0_i32_0 = arith.constant 0 : i32
    %c0_i32_1 = arith.constant 0 : i32
    return %arg0, %c0_i32, %c0_i32_0 : i32, i32, i32
  }
  func.func @transform_3(%arg0: i32) -> (i32, i32) {
    %c0_i32 = arith.constant 0 : i32
    %c0_i32_0 = arith.constant 0 : i32
    %c0_i32_1 = arith.constant 0 : i32
    return %c0_i32, %c0_i32_0 : i32, i32
  }
  func.func @transform_4(%arg0: i32) -> (i32, i32) {
    %c0_i32 = arith.constant 0 : i32
    %c0_i32_0 = arith.constant 0 : i32
    %c0_i32_1 = arith.constant 0 : i32
    return %c0_i32, %c0_i32_0 : i32, i32
  }
  func.func @transform_5(%arg0: i32) -> (i32, i32) {
    %c0_i32 = arith.constant 0 : i32
    %c0_i32_0 = arith.constant 0 : i32
    %c0_i32_1 = arith.constant 0 : i32
    return %c0_i32, %c0_i32_0 : i32, i32
  }
  func.func @transform_6(%arg0: i32) -> (i32, i32) {
    %c0_i32 = arith.constant 0 : i32
    %c0_i32_0 = arith.constant 0 : i32
    %c0_i32_1 = arith.constant 0 : i32
    return %c0_i32, %c0_i32_0 : i32, i32
  }
  func.func @transform_7(%arg0: i32) -> (i32, i32) {
    %c0_i32 = arith.constant 0 : i32
    %c0_i32_0 = arith.constant 0 : i32
    %c0_i32_1 = arith.constant 0 : i32
    return %c0_i32, %c0_i32_0 : i32, i32
  }
  func.func @transform_8(%arg0: i32) -> (i32, i32) {
    %c0_i32 = arith.constant 0 : i32
    %c0_i32_0 = arith.constant 0 : i32
    %c0_i32_1 = arith.constant 0 : i32
    return %c0_i32, %c0_i32_0 : i32, i32
  }
  func.func @transform_9(%arg0: i32) -> (i32, i32) {
    %c0_i32 = arith.constant 0 : i32
    %c0_i32_0 = arith.constant 0 : i32
    %c0_i32_1 = arith.constant 0 : i32
    return %c0_i32, %c0_i32_0 : i32, i32
  }
  func.func @transform_10(%arg0: i32) -> (i32, i32) {
    %c0_i32 = arith.constant 0 : i32
    %c0_i32_0 = arith.constant 0 : i32
    %c0_i32_1 = arith.constant 0 : i32
    return %c0_i32, %c0_i32_0 : i32, i32
  }
  func.func @transform_11(%arg0: i32) -> (i32, i32) {
    %c0_i32 = arith.constant 0 : i32
    %c0_i32_0 = arith.constant 0 : i32
    %c0_i32_1 = arith.constant 0 : i32
    return %c0_i32, %c0_i32_0 : i32, i32
  }
  func.func @transform_12(%arg0: i32) -> (i32, i32, i32) {
    %c0_i32 = arith.constant 0 : i32
    %c0_i32_0 = arith.constant 0 : i32
    %c0_i32_1 = arith.constant 0 : i32
    return %arg0, %c0_i32, %c0_i32_0 : i32, i32, i32
  }
}

</mosaic_0001>

<bundles_post_ra>
// kernel: tpu_custom_call.1
= control target key start
LH: loop header
LB: loop body
LE: loop exit
PB: predicated region body
PF: predicated region fallthrough
CT: control target
= control target key end

     0   :  { %s4418_s0 = inlined_call_operand.hbm [shape: bf16[2,8,32], index: 0, kind: input, shape index: {}]   ;;  %s4419_s1 = inlined_call_operand.hbm [shape: bf16[2,8,32], index: 1, kind: input, shape index: {}]   ;;  %s4420_s2 = inlined_call_operand.hbm [shape: bf16[2,8,32], index: 2, kind: input, shape index: {}]   ;;  %s4421_s3 = inlined_call_operand.hbm [shape: bf16[32,96], index: 3, kind: input, shape index: {}]   ;;  %s4422_s4 = inlined_call_operand.hbm [shape: bf16[32,96], index: 4, kind: input, shape index: {}]   ;;  %s4423_s5 = inlined_call_operand.hbm [shape: bf16[32,96], index: 5, kind: input, shape index: {}]   ;;  %s4424_s6 = inlined_call_operand.vmem [shape: f32[1,96], index: 6, kind: input, shape index: {}]   ;;  %s4425_s7 = inlined_call_operand.vmem [shape: f32[1,96], index: 7, kind: input, shape index: {}]   ;;  %s4426_s8 = inlined_call_operand.vmem [shape: f32[1,8], index: 8, kind: input, shape index: {}]   ;;  %s4427_s9 = inlined_call_operand.vmem [shape: f32[1,8], index: 9, kind: input, shape index: {}]   ;;  %s4428_s10 = inlined_call_operand.vmem [shape: f32[1,8], index: 10, kind: input, shape index: {}]   ;;  %s4429_s11 = inlined_call_operand.vmem [shape: f32[1,8], index: 11, kind: input, shape index: {}]   ;;  %s4430_s12 = inlined_call_operand.hbm [shape: f32[2,8,64], index: 12, kind: output, shape index: {}]  }
   0x1   :  { %4453 = sst [smem:[#allocation25_spill]] %s4419_s1 }
   0x2   :  { %4454 = sst [smem:[#allocation26_spill]] %s4421_s3 }
   0x3   :  { %4455 = sst [smem:[#allocation27_spill]] %s4427_s9 }
   0x4   :  { %4456 = sst [smem:[#allocation28_spill]] %s4428_s10 }
   0x5   :  { %4457 = sst [smem:[#allocation29_spill]] %s4429_s11 }
   0x6   :  { %4458 = sst [smem:[#allocation30_spill]] %s4430_s12 }
   0x7   :  { %17 = vsyncpa [#allocation3], 0 }
   0x8   :  { %19 = vsyncpa [#allocation3 + $0x1], 0 }
   0x9   :  { %20 = vsyncpa [#allocation6], 0 }
   0xa   :  { %22 = vsyncpa [#allocation6 + $0x1], 0 }
   0xb   :  { %23 = vsyncpa [#allocation9], 0 }
   0xc   :  { %24 = vsyncpa [#allocation12], 0 }
   0xd   :  { %25 = vsyncpa [#allocation4], 0 }
   0xe   :  { %27 = vsyncpa [#allocation4 + $0x1], 0  ;;  %s3353_s21 = smov 0   ;;  %s3355_s22 = smov 0  }
   0xf   :  { %s3357_s23 = smov 0   ;;  %s3359_s24 = smov 0  }
  0x10 LB: > { %4459 = sst [smem:[#allocation19_spill]] %s3252_s21  ;;  %s3374_s25 = sadd.s32 4294967295, %s3264_s24   ;;  %s3264_s24 = sphi %s3359_s24, %s4502_s24   ;;  %s3260_s23 = sphi %s3357_s23, %s4506_s23   ;;  %s3256_s22 = sphi %s3355_s22, %s4505_s22   ;;  %s3252_s21 = sphi %s3353_s21, %s4504_s21  }
  0x11   : > { %4460 = sst [smem:[#allocation20_spill]] %s3264_s24  ;;  %s2724_s26 = sadd.s32 4294967294, %s3264_s24  }
  0x12   : > { %p53_p0 = scmp.ne.s32.totalorder %s3256_s22, %s3252_s21  ;;  %p4444_p1 = scmp.eq.s32.totalorder %s3374_s25, 0 }
  0x13   : > { %p318_p2 = scmp.eq.s32.totalorder %s3374_s25, 1  ;;  %p324_p3 = scmp.eq.s32.totalorder %s2724_s26, 1 }
  0x14   : > { %p3383_p4 = por %p4444_p1, %p53_p0  ;;  %p2725_p5 = scmp.ge.s32.totalorder %s3264_s24, 1 }
  0x15   : > { %p3388_p6 = por %p324_p3, %p53_p0  ;;  %p331_p7 = scmp.lt.s32.totalorder %s3264_s24, 3 }
  0x16   : > { %s4461_s27 = scalar_select %p3383_p4, 1, 0 }
  0x17   : > { %s4462_s28 = scalar_select %p3388_p6, 1, 0 }
  0x18   : > { %p3393_p8 = pnand %p2725_p5, %p331_p7  ;;  %s3266_s30 = smov [#allocation8]  }
  0x19   : > { %4463 = sst [smem:[#allocation21_spill]] %s4462_s28  ;;  %s343_s13 = sshll.u32 %s3266_s30, 4  ;;  %s344_s13 = int_to_ptr.vmem [resolvable:$true] %s343_s13 }
  0x1a   : > { %s4464_s29 = scalar_select %p3393_p8, 1, 0 }
  0x1b   : > { %p2890_p9 = pneg %p3393_p8  ;;  %s3407_s15 = sadd.s32 1, %s3264_s24  }
  0x1c   : > { %4466 = sst [smem:[#allocation22_spill]] %s3407_s15  ;;  %s40_s16 = sadd.s32 1, %s3260_s23 }
  0x1d   : > { %p3402_p11 = pnand %p2890_p9, %p4444_p1  ;;  %s37_s17 = ssub.s32 %s3264_s24, %s3407_s15 }
  0x1e   : > { %s3037_s18 = scalar_lea.vmem %s344_s13, 256  ;;  %p3045_p5 = scmp.lt.s32.totalorder %s344_s13, %s344_s13 }
  0x1f   : > { %s4465_s14 = scalar_select %p3402_p11, 1, 0 }
  0x20   : > { %p4445_p12 = pneg %p3402_p11  ;;  %p3038_p13 = scmp.ne.s32.totalorder %s344_s13, %s3037_s18 }
  0x21   : > { %p3046_p7 = scmp.lt.s32.totalorder %s3037_s18, %s3037_s18 }
  0x22   : > { %p3040_p0 = pnand %p3038_p13, %p4445_p12 }
  0x23   : > { %p3047_p9 = por %p3046_p7, %p3045_p5 }
  0x24   : > { %p3041_p3 = pneg %p3040_p0 }
  0x26   : > { %p3048_p10 = pnand %p3047_p9, %p3041_p3 }
  0x28   : > { %3051 = shalt.err (!%p3048_p10)
}
  0x29   : > { %s4436_s19 = smov 64   ;;  %s4438_s20 = smov 4  }
  0x2a   : > { %s4467_s3 = sld [smem:[#allocation26_spill]]  ;;  %p38_p10 = scmp.eq.s32.totalorder %s37_s17, 0 }
  0x2b   : > { %p47_p13 = scmp.ne.s32.totalorder %s3260_s23, %s3256_s22  ;;  %p48_p0 = scmp.eq.s32.totalorder %s3264_s24, 0 }
  0x2c   : > { %p2917_p3 = scmp.lt.s32.totalorder %s3264_s24, 2  ;;  %s4440_s28 = sand.u32 1, %s3260_s23  }
  0x2d   : > { %s3430_s18 = scalar_select %p38_p10, %s3260_s23, %s40_s16  }
  0x2e   : > { %p49_p5 = por %p48_p0, %p47_p13  ;;  %p3434_p7 = por %p318_p2, %p47_p13 }
  0x2f   : > { %4468 = sst [smem:[#allocation23_spill]] %s3430_s18  ;;  %s3440_s21 = sshll.u32 %s3264_s24, 6 }
  0x30   : > { %2893 = dma.hbm_to_vmem [thread:$0]  (!%p3402_p11), %s4467_s3, 256, %s344_s13, [#allocation9], %s4436_s19, %s4436_s19, %s4438_s20  }
  0x31   : > { %s4469_s15 = scalar_select %p3434_p7, 1, 0 }
  0x32   : > { %s3444_s12 = sshll.u32 %s4440_s28, 2  ;;  %p3446_p9 = pnand %p2917_p3, %p49_p5 }
  0x33   : > { %4470 = sst [smem:[#allocation24_spill]] %s4469_s15  ;;  %s419_s16 = sand.u32 1, %s3264_s24  }
  0x34   : > { %s4472_s1 = sld [smem:[#allocation25_spill]]  ;;  %s423_s19 = scalar_lea.vmem [#allocation5], %s3444_s12 }
  0x35   : > { %s430_s20 = sshll.u32 %s423_s19, 4  ;;  %s3458_s28 = scalar_lea.sflag [#allocation6], %s419_s16  ;;  %s431_s20 = int_to_ptr.vmem [resolvable:$true] %s430_s20 }
  0x36   : > { %p3464_p10 = pneg %p3446_p9 }
  0x3a   : > { %s3455_s30 = scalar_lea.hbm %s4472_s1, %s3440_s21  ;;  %s3057_s24 = scalar_lea.hbm %s4472_s1, 128 }
  0x3b   : > { %s3052_s3 = scalar_lea.hbm %s3455_s30, 64  ;;  %p3058_p3 = scmp.lt.s32.totalorder %s3455_s30, %s4472_s1 }
  0x3c   : > { %p3053_p2 = scmp.ne.s32.totalorder %s3455_s30, %s3052_s3  ;;  %p3059_p5 = scmp.lt.s32.totalorder %s3057_s24, %s3052_s3 }
  0x3e   : > { %p3055_p13 = pnand %p3464_p10, %p3053_p2  ;;  %p3060_p1 = por %p3059_p5, %p3058_p3 }
  0x40   : > { %p3056_p0 = pneg %p3055_p13 }
  0x42   : > { %p3061_p12 = pnand %p3060_p1, %p3056_p0 }
  0x44   : > { %3064 = shalt.err (!%p3061_p12)
}
  0x45   : > { %s3065_s16 = scalar_lea.vmem %s431_s20, 64  ;;  %s3269_s11 = smov [#allocation5]  }
  0x46   : > { %p3066_p6 = scmp.ne.s32.totalorder %s431_s20, %s3065_s16  ;;  %s3070_s10 = sshll.u32 %s3269_s11, 4  ;;  %s3071_s10 = int_to_ptr.vmem [resolvable:$false] %s3070_s10 }
  0x47   : > { %s3072_s9 = scalar_lea.vmem %s3071_s10, 128  ;;  %p3073_p2 = scmp.lt.s32.totalorder %s431_s20, %s3071_s10 }
  0x48   : > { %p3068_p7 = pnand %p3066_p6, %p3464_p10  ;;  %p3074_p13 = scmp.lt.s32.totalorder %s3072_s9, %s3065_s16 }
  0x4a   : > { %p3069_p4 = pneg %p3068_p7  ;;  %p3075_p8 = por %p3074_p13, %p3073_p2 }
  0x4c   : > { %p3076_p11 = pnand %p3075_p8, %p3069_p4 }
  0x4e   : > { %3079 = shalt.err (!%p3076_p11)
}
  0x4f   : > { %2906 = dma.hbm_to_vmem [thread:$0]  (!%p3446_p9), %s3455_s30, 64, %s431_s20, %s3458_s28  }
  0x50   : > { %s3270_s3 = smov [#allocation10]   ;;  %s3271_s15 = smov [#allocation11]  }
  0x51   : > { %s356_s24 = sshll.u32 %s3270_s3, 4  ;;  %s369_s17 = sshll.u32 %s3271_s15, 4  ;;  %s357_s24 = int_to_ptr.vmem [resolvable:$true] %s356_s24  ;;  %s370_s17 = int_to_ptr.vmem [resolvable:$true] %s369_s17 }
  0x52   : > { %s3091_s26 = scalar_lea.vmem %s357_s24, 256  ;;  %p4474_p6 = scmp.ne.s32.totalorder %s4465_s14, 0 }
  0x53   : > { %p3092_p1 = scmp.ne.s32.totalorder %s357_s24, %s3091_s26  ;;  %p3099_p3 = scmp.lt.s32.totalorder %s357_s24, %s357_s24 }
  0x54   : > { %p4475_p12 = pneg %p4474_p6  ;;  %p3100_p4 = scmp.lt.s32.totalorder %s3091_s26, %s3091_s26 }
  0x56   : > { %p3094_p7 = pnand %p3092_p1, %p4475_p12  ;;  %p3101_p8 = por %p3100_p4, %p3099_p3 }
  0x58   : > { %p3095_p0 = pneg %p3094_p7 }
  0x5a   : > { %p3102_p11 = pnand %p3101_p8, %p3095_p0 }
  0x5c   : > { %3105 = shalt.err (!%p3102_p11)
}
  0x5d   : > { %s4476_s9 = smov 4   ;;  %s4477_s10 = smov 64  }
  0x5e   : > { %2896 = dma.hbm_to_vmem [thread:$0]  (!%p4474_p6), %s4422_s4, 256, %s357_s24, [#allocation9], %s4477_s10, %s4477_s10, %s4476_s9  }
  0x5f   : > { %s3117_s30 = scalar_lea.vmem %s370_s17, 256  ;;  %p4478_p2 = pmov %p4475_p12 }
  0x60   : > { %p3118_p5 = scmp.ne.s32.totalorder %s370_s17, %s3117_s30  ;;  %p3125_p12 = scmp.lt.s32.totalorder %s370_s17, %s370_s17 }
  0x61   : > { %p3126_p7 = scmp.lt.s32.totalorder %s3117_s30, %s3117_s30 }
  0x62   : > { %p3120_p13 = pnand %p3118_p5, %p4478_p2 }
  0x63   : > { %p3127_p0 = por %p3126_p7, %p3125_p12 }
  0x64   : > { %p3121_p1 = pneg %p3120_p13 }
  0x66   : > { %p3128_p3 = pnand %p3127_p0, %p3121_p1 }
  0x68   : > { %3131 = shalt.err (!%p3128_p3)
}
  0x69   : > { %2899 = dma.hbm_to_vmem [thread:$0]  (!%p4474_p6), %s4423_s5, 256, %s370_s17, [#allocation12], %s4477_s10, %s4477_s10, %s4476_s9  }
  0x6a   : > { %s3509_s15 = scalar_lea.hbm %s4418_s0, %s3440_s21  ;;  %s405_s14 = scalar_lea.vmem [#allocation2], %s3444_s12 }
  0x6b   : > { %s412_s26 = sshll.u32 %s405_s14, 4  ;;  %s3516_s30 = scalar_lea.hbm %s4420_s2, %s3440_s21  ;;  %s413_s26 = int_to_ptr.vmem [resolvable:$true] %s412_s26 }
  0x6c   : > { %s4479_s19 = sand.u32 1, %s3260_s23   ;;  %s3132_s1 = scalar_lea.hbm %s3509_s15, 64 }
  0x6d   : > { %s402_s16 = scalar_lea.sflag [#allocation3], %s4479_s19  ;;  %p3133_p6 = scmp.ne.s32.totalorder %s3509_s15, %s3132_s1 }
  0x6e   : > { %s3137_s10 = scalar_lea.hbm %s4418_s0, 128  ;;  %p3138_p11 = scmp.lt.s32.totalorder %s3509_s15, %s4418_s0 }
  0x6f   : > { %p3135_p4 = pnand %p3133_p6, %p3464_p10  ;;  %p3139_p5 = scmp.lt.s32.totalorder %s3137_s10, %s3132_s1 }
  0x71   : > { %p3136_p8 = pneg %p3135_p4  ;;  %p3140_p2 = por %p3139_p5, %p3138_p11 }
  0x73   : > { %p3141_p13 = pnand %p3140_p2, %p3136_p8 }
  0x75   : > { %3144 = shalt.err (!%p3141_p13)
}
  0x76   : > { %s3145_s21 = scalar_lea.vmem %s413_s26, 64  ;;  %s3272_s14 = smov [#allocation2]  }
  0x77   : > { %p3146_p1 = scmp.ne.s32.totalorder %s413_s26, %s3145_s21  ;;  %s3150_s11 = sshll.u32 %s3272_s14, 4  ;;  %s3151_s11 = int_to_ptr.vmem [resolvable:$false] %s3150_s11 }
  0x78   : > { %s3152_s20 = scalar_lea.vmem %s3151_s11, 128  ;;  %p3153_p0 = scmp.lt.s32.totalorder %s413_s26, %s3151_s11 }
  0x79   : > { %p3148_p12 = pnand %p3146_p1, %p3464_p10  ;;  %p3154_p3 = scmp.lt.s32.totalorder %s3152_s20, %s3145_s21 }
  0x7b   : > { %p3149_p7 = pneg %p3148_p12  ;;  %p3155_p6 = por %p3154_p3, %p3153_p0 }
  0x7d   : > { %p3156_p4 = pnand %p3155_p6, %p3149_p7 }
  0x7f   : > { %3159 = shalt.err (!%p3156_p4)
}
  0x80   : > { %2903 = dma.hbm_to_vmem [thread:$0]  (!%p3446_p9), %s3509_s15, 64, %s413_s26, %s402_s16  }
  0x81   : > { %s441_s1 = scalar_lea.vmem [#allocation7], %s3444_s12  ;;  %s3160_s17 = scalar_lea.hbm %s3516_s30, 64 }
  0x82   : > { %s448_s19 = sshll.u32 %s441_s1, 4  ;;  %p3161_p8 = scmp.ne.s32.totalorder %s3516_s30, %s3160_s17  ;;  %s449_s19 = int_to_ptr.vmem [resolvable:$true] %s448_s19 }
  0x83   : > { %s3165_s3 = scalar_lea.hbm %s4420_s2, 128  ;;  %p3166_p2 = scmp.lt.s32.totalorder %s3516_s30, %s4420_s2 }
  0x84   : > { %p3163_p11 = pnand %p3161_p8, %p3464_p10  ;;  %p3167_p13 = scmp.lt.s32.totalorder %s3165_s3, %s3160_s17 }
  0x86   : > { %p3164_p5 = pneg %p3163_p11  ;;  %p3168_p1 = por %p3167_p13, %p3166_p2 }
  0x88   : > { %p3169_p12 = pnand %p3168_p1, %p3164_p5 }
  0x8a   : > { %3172 = shalt.err (!%p3169_p12)
}
  0x8b   : > { %s3173_s12 = scalar_lea.vmem %s449_s19, 64  ;;  %s3273_s15 = smov [#allocation7]  }
  0x8c   : > { %p3174_p7 = scmp.ne.s32.totalorder %s449_s19, %s3173_s12  ;;  %s3178_s26 = sshll.u32 %s3273_s15, 4  ;;  %s3179_s26 = int_to_ptr.vmem [resolvable:$false] %s3178_s26 }
  0x8d   : > { %s3180_s16 = scalar_lea.vmem %s3179_s26, 128  ;;  %p3181_p6 = scmp.lt.s32.totalorder %s449_s19, %s3179_s26 }
  0x8e   : > { %p3176_p0 = pnand %p3174_p7, %p3464_p10  ;;  %p3182_p4 = scmp.lt.s32.totalorder %s3180_s16, %s3173_s12 }
  0x90   : > { %p3177_p3 = pneg %p3176_p0  ;;  %p3183_p8 = por %p3182_p4, %p3181_p6 }
  0x92   : > { %p3184_p11 = pnand %p3183_p8, %p3177_p3 }
  0x94   : > { %3187 = shalt.err (!%p3184_p11)
}
  0x95   : > { %2909 = dma.hbm_to_vmem [thread:$0]  (!%p3446_p9), %s3516_s30, 64, %s449_s19, %s3458_s28  }
  0x96   : > { %p4480_p5 = scmp.ne.s32.totalorder %s4464_s29, 0 }
  0x97   : > { %s3557_s18 = sand.u32 (!%p4480_p5), 1, %s3256_s22   ;;  %p4481_p10 = scmp.ne.s32.totalorder (!%p4480_p5), %s4461_s27, 0 }
  0x98   : > { %457 = sbr.rel (%p4480_p5) target bundleno = 2067 (0x813), region = 68  ;;  %s3560_s14 = sshll.u32 (!%p4480_p5), %s3557_s18, 2 }
  0x99   : > { %s460_s11 = scalar_lea.sflag (!%p4480_p5), [#allocation3], %s3557_s18  ;;  %s463_s20 = scalar_lea.vmem (!%p4480_p5), [#allocation2], %s3560_s14 }
  0x9d   : > { %3231 = dma.done.wait (%p4481_p10), %s460_s11, 64  }
  0x9e   : > { %3233 = vsyncadd (%p4481_p10), %s460_s11, 4294967232  ;;  %s468_s28 = sand.u32 1, %s3374_s25   ;;  %s472_s13 = scalar_lea.vmem [#allocation5], %s3560_s14 }
  0x9f   : > { %s469_s29 = scalar_lea.sflag [#allocation6], %s468_s28 }
  0xa0   : > { %3235 = dma.done.wait (%p4481_p10), %s469_s29, 128  }
  0xa1   : > { %3237 = vsyncadd (%p4481_p10), %s469_s29, 4294967168  ;;  %s481_s30 = scalar_lea.vmem [#allocation7], %s3560_s14  ;;  %p4482_p9 = scmp.eq.s32.totalorder %s3374_s25, 0 }
  0xa3   : > { %3239 = dma.done.wait (%p4482_p9), [#allocation9], 512   ;;  %p4483_p2 = pmov %p4482_p9 }
  0xa5   : > { %3241 = vsyncadd (%p4483_p2), [#allocation9], 4294966784  ;;  %p4484_p13 = pmov %p4483_p2 }
  0xa6   : > { %p4485_p1 = pmov %p4483_p2 }
  0xa7   : > { %3243 = dma.done.wait (%p4484_p13), [#allocation12], 256  }
  0xa8   : > { %3245 = vsyncadd (%p4485_p1), [#allocation12], 4294967040  ;;  %v4451_v0 = vmov 0.0   ;;  %vm3275_vm0 = vmmov 0   ;;  %v2972_v1 = vld [vmem:[#allocation8 + $0x8] sm:$0xff]   ;;  %v2973_v2 = vld [vmem:[#allocation10 + $0x8] sm:$0xff]   ;;  %v760_v34 = vlaneseq }
  0xa9   : > { %2798 = vmatprep.subr.bf16.mxu0 %v4451_v0  ;;  %2806 = vmatprep.subr.bf16.mxu1 %v4451_v0  ;;  %v2974_v3 = vld [vmem:[#allocation8] sm:$0xff]   ;;  %v2975_v4 = vld [vmem:[#allocation10] sm:$0xff]   ;;  %v545_v5 = vld [vmem:[%s463_s20] sm:$0xf]  ;;  %vm564_vm1 = vcmask 261120   ;;  %s3276_s19 = smov 104  }
  0xaa   : > { %2802 = vmatprep.mubr.msk.bf16.mxu0 %vm3275_vm0, %v4451_v0  ;;  %2810 = vmatprep.mubr.msk.bf16.mxu1 %vm3275_vm0, %v4451_v0  ;;  %v2976_v6 = vld [vmem:[#allocation11 + $0x8] sm:$0xff]   ;;  %v546_v7 = vld [vmem:[%s472_s13] sm:$0xf]  ;;  %v2977_v8 = vld [vmem:[#allocation11] sm:$0xff]   ;;  %s3277_s17 = smov 120   ;;  %s3278_s3 = smov 112  }
  0xab   : > { %2799 = vmatpush3.bf16.msra.mxu0 %v2972_v1  ;;  %2807 = vmatpush3.bf16.msra.mxu1 %v2973_v2  ;;  %v547_v9 = vld [vmem:[%s481_s30] sm:$0xf]  ;;  %v2753_v12 = vld [vmem:[%s4424_s6] ss:$0 sm:$0xff]  ;;  %s3279_s24 = smov 96   ;;  %v761_v36 = vshrl.u32 %v760_v34, 7 }
  0xac   : > { %2800 = vmatprep.subr.bf16.mxu0 %v4451_v0  ;;  %2808 = vmatprep.subr.bf16.mxu1 %v4451_v0  ;;  %v2754_v23 = vld [vmem:[%s4425_s7] ss:$0 sm:$0xff]  ;;  %v3280_v32 = vmov 1983009808   ;;  %v3281_v44 = vmov 1934713408  }
  0xad   : > { %v758_v33 = vunpack.c.l.s4 %v3280_v32  ;;  %v790_v45 = vunpack.c.l.s4 %v3281_v44  ;;  %vm1247_vm2 = vcmask 60416   ;;  %s4486_s16 = sld [smem:[#allocation27_spill]]  ;;  %s3282_s14 = smov 8   ;;  %vm1571_vm3 = vcmask 64512  }
  0xae   : > { %s4487_s28 = sld [smem:[#allocation28_spill]]  ;;  %s3283_s27 = smov 64   ;;  %vm1876_vm4 = vcmask 130048   ;;  %vm2112_vm5 = vcmask 1043456   ;;  %vm2444_vm6 = vcmask 195584   ;;  %vm2566_vm7 = vcmask 523264  }
  0xaf   : > { %2801 = vmatpush3.bf16.msra.mxu0 %v2974_v3  ;;  %2809 = vmatpush3.bf16.msra.mxu1 %v2975_v4  ;;  %v759_v35 = vunpack.c.0.s8 %v758_v33  ;;  %v791_v50 = vunpack.c.0.s8 %v790_v45  ;;  %s4488_s30 = sld [smem:[#allocation29_spill]]  ;;  %s3284_s1 = smov 16  }
  0xb0   : > { %2814 = vmatprep.subr.bf16.mxu0 %v4451_v0  ;;  %2822 = vmatprep.subr.bf16.mxu1 %v4451_v0  ;;  %s4494_s9 = sld [smem:[#allocation24_spill]]  ;;  %s2743_s10 = sshll.u32 %s3557_s18, 3 }
  0xb1   : > { %v3641_v39 = vsub.s32 %v759_v35, %v761_v36  ;;  %v3658_v54 = vsub.s32 %v791_v50, %v761_v36  ;;  %s4495_s26 = sld [smem:[#allocation30_spill]] }
  0xb2   : > { %2803 = vmatmul.mubr.msk.bf16.vlgmr.msra.gmra.mxu0 %vm564_vm1, %v545_v5  ;;  %2811 = vmatmul.mubr.msk.bf16.vlgmr.msra.gmra.mxu1 %vm564_vm1, %v546_v7 }
  0xb3   : > { %2815 = vmatpush3.bf16.msra.mxu0 %v2976_v6  ;;  %2818 = vmatprep.mubr.msk.bf16.mxu0 %vm3275_vm0, %v4451_v0 }
  0xb4   : > { %2816 = vmatprep.subr.bf16.mxu0 %v4451_v0  ;;  %2824 = vmatprep.mubr.msk.bf16.mxu1 %vm3275_vm0, %v4451_v0 }
  0xb6   : > { %p4496_p7 = scmp.ne.s32.totalorder %s4494_s9, 0 }
  0xb7   : > { %2817 = vmatpush3.bf16.msra.mxu0 %v2977_v8 }
  0xb8   : > { %2828 = vmatprep.subr.bf16.mxu0 %v4451_v0 }
  0xba   : > { %2819 = vmatmul.mubr.msk.bf16.vlgmr.msra.gmra.mxu0 %vm564_vm1, %v547_v9 }
  0xbb   : > { %2830 = vmatprep.mubr.msk.bf16.mxu0 %vm3275_vm0, %v4451_v0 }
 0x172   : > { %v602_v10 = vpop.f32.mrf.mxu0  ;;  %v661_v11 = vpop.f32.mrf.mxu1 }
 0x173   : > { %v726_v13 = vsub.f32 %v602_v10, %v661_v11 }
 0x174   : > { %v2804_v14 = vpop.f32.mrf.mxu0  ;;  %v2812_v15 = vpop.f32.mrf.mxu1 }
 0x175   : > { %v3609_v16 = vadd.f32 %v2753_v12, %v726_v13 }
 0x176   : > { %v605_v17 = vpop.f32.mrf.mxu0  ;;  %v664_v18 = vpop.f32.mrf.mxu1 }
 0x177   : > { %752 = vrot.lane.b32.xlu1 %v3609_v16, %s3276_s19  ;;  %746 = vrot.lane.b32.xlu0 %v3609_v16, %s3277_s17 }
 0x178   : > { %v2805_v19 = vpop.f32.mrf.mxu0  ;;  %v2813_v20 = vpop.f32.mrf.mxu1 }
 0x17a   : > { %v720_v21 = vpop.f32.mrf.mxu0 }
 0x17b   : > { %v735_v22 = vsub.f32 %v720_v21, %v602_v10  ;;  %749 = vrot.lane.b32.xlu0 %v3609_v16, %s3278_s3 }
 0x17c   : > { %v2820_v24 = vpop.f32.mrf.mxu0 }
 0x17d   : > { %v736_v25 = vsub.f32 %v735_v22, %v661_v11 }
 0x17e   : > { %v723_v26 = vpop.f32.mrf.mxu0 }
 0x17f   : > { %v3618_v27 = vadd.f32 %v2754_v23, %v736_v25 }
 0x180   : > { %v2821_v28 = vpop.f32.mrf.mxu0 }
 0x181   : > { %827 = vrot.lane.b32.xlu0 %v3618_v27, %s3278_s3  ;;  %824 = vrot.lane.b32.xlu1 %v3618_v27, %s3277_s17  ;;  %s2770_s3 = sshll.u32 %s3374_s25, 7  ;;  %s3287_s25 = smov [#allocation13]  }
 0x182   : > { %s3192_s20 = sshll.u32 %s3287_s25, 4  ;;  %s3193_s20 = int_to_ptr.vmem [resolvable:$false] %s3192_s20 }
 0x185   : > { %901 = vrot.lane.b32.xlu0 %v3609_v16, %s3279_s24  ;;  %830 = vrot.lane.b32.xlu1 %v3618_v27, %s3276_s19  ;;  %s3285_s19 = smov 24  }
 0x189   : > { %981 = vrot.lane.b32.xlu0 %v3618_v27, %s3279_s24 }
 0x1e9   : > { %v3626_v29 = vpop.permute.xlu0 %746  ;;  %v3629_v30 = vpop.permute.xlu1 %752 }
 0x1ea   : > { %903 = vrot.lane.b32.xlu1 %v3626_v29, %s3279_s24  ;;  %v771_v46 = vcombine.low %v3626_v29, %v3629_v30  ;;  %v772_v45 = vcombine.high %v3626_v29, %v3629_v30 }
 0x1ec   : > { %v779_v51 = vrot.slane %v771_v46, %v3641_v39 }
 0x1ed   : > { %v3631_v31 = vpop.permute.xlu0 %749 }
 0x1ee   : > { %905 = vrot.lane.b32.xlu0 %v3631_v31, %s3279_s24  ;;  %907 = vrot.lane.b32.xlu1 %v3629_v30, %s3279_s24  ;;  %v755_v41 = vcombine.low %v3609_v16, %v3631_v31 }
 0x1f0   : > { %v763_v48 = vrot.slane %v755_v41, %v3641_v39 }
 0x1f2   : > { %v787_v53 = vcombine.low %v763_v48, %v779_v51  ;;  %v788_v57 = vcombine.high %v763_v48, %v779_v51 }
 0x1f3   : > { %v3635_v37 = vpop.permute.xlu0 %827  ;;  %v3637_v38 = vpop.permute.xlu1 %824 }
 0x1f4   : > { %985 = vrot.lane.b32.xlu0 %v3635_v37, %s3279_s24  ;;  %983 = vrot.lane.b32.xlu1 %v3637_v38, %s3279_s24  ;;  %v833_v42 = vcombine.low %v3618_v27, %v3635_v37  ;;  %v3664_v58 = vrot.slane %v787_v53, %v3658_v54  ;;  %v3678_v62 = vrot.slane %v788_v57, %v3658_v54 }
 0x1f5   : > { %v834_v53 = vcombine.high %v3618_v27, %v3635_v37 }
 0x1f6   : > { %v841_v49 = vrot.slane %v833_v42, %v3641_v39  ;;  %v3675_v61 = vcombine.high %v3664_v58, %v4451_v0  ;;  %v3690_v3 = vcombine.high %v3678_v62, %v4451_v0  ;;  %v1223_v10 = vmul.f32 %v3664_v58, %v3664_v58 }
 0x1f7   : > { %v3643_v40 = vpop.permute.xlu1 %830  ;;  %v1225_v14 = vmul.f32 %v3678_v62, %v3678_v62  ;;  %v902_v19 = vpop.permute.xlu0 %901  ;;  %v756_v42 = vcombine.high %v3609_v16, %v3631_v31 }
 0x1f8   : > { %v849_v43 = vcombine.low %v3637_v38, %v3643_v40  ;;  %987 = vrot.lane.b32.xlu1 %v3643_v40, %s3279_s24  ;;  %v1224_v2 = vmul.f32 %v3675_v61, %v3675_v61  ;;  %v1226_v6 = vmul.f32 %v3690_v3, %v3690_v3  ;;  %v850_v46 = vcombine.high %v3637_v38, %v3643_v40  ;;  %s543_s24 = scalar_lea.vmem [#allocation13], %s2743_s10 }
 0x1f9   : > { %s2582_s21 = sshll.u32 %s543_s24, 4  ;;  %s2583_s21 = int_to_ptr.vmem [resolvable:$true] %s2582_s21 }
 0x1fa   : > { %v857_v47 = vrot.slane %v849_v43, %v3641_v39  ;;  %s3188_s11 = scalar_lea.vmem %s2583_s21, 128  ;;  %p3195_p6 = scmp.lt.s32.totalorder %s2583_s21, %s3193_s20 }
 0x1fb   : > { %v982_v20 = vpop.permute.xlu0 %981  ;;  %p3189_p12 = scmp.ne.s32.totalorder %s2583_s21, %s3188_s11 }
 0x1fc   : > { %v865_v52 = vcombine.low %v841_v49, %v857_v47  ;;  %v866_v55 = vcombine.high %v841_v49, %v857_v47 }
 0x1fd   : > { %p3190_p0 = pnand %p3189_p12, %p4496_p7 }
 0x1fe   : > { %v3661_v56 = vrot.slane %v865_v52, %v3658_v54  ;;  %v3671_v60 = vrot.slane %v866_v55, %v3658_v54  ;;  %v3719_v52 = vrot.slane %v756_v42, %v3641_v39 }
 0x1ff   : > { %p3191_p3 = pneg %p3190_p0 }
 0x200   : > { %v3668_v59 = vcombine.high %v3661_v56, %v4451_v0  ;;  %v3684_v1 = vcombine.high %v3671_v60, %v4451_v0  ;;  %v1231_v9 = vmul.f32 %v3661_v56, %v3661_v56  ;;  %v1233_v13 = vmul.f32 %v3671_v60, %v3671_v60 }
 0x202   : > { %v1232_v63 = vmul.f32 %v3668_v59, %v3668_v59  ;;  %v1234_v5 = vmul.f32 %v3684_v1, %v3684_v1  ;;  %v1239_v12 = vadd.f32 %v1231_v9, %v1223_v10  ;;  %v1241_v17 = vadd.f32 %v1233_v13, %v1225_v14 }
 0x204   : > { %v1240_v4 = vadd.f32 %v1232_v63, %v1224_v2  ;;  %v1242_v8 = vadd.f32 %v1234_v5, %v1226_v6  ;;  %v1248_v15 = vsel %vm1247_vm2, %v1239_v12, 0.0  ;;  %v1254_v18 = vsel %vm1247_vm2, %v1241_v17, 0.0 }
 0x205   : > { %v786_v6 = vrot.slane %v772_v45, %v3641_v39 }
 0x206   : > { %v1251_v7 = vsel %vm1247_vm2, %v1240_v4, 0.0  ;;  %v1257_v11 = vsel %vm1247_vm2, %v1242_v8, 0.0 }
 0x207   : > { %v803_v14 = vcombine.low %v3719_v52, %v786_v6 }
 0x213   : > { %1252 = vadd.xlane.f32.xlu0 %v1251_v7  ;;  %v864_v7 = vrot.slane %v850_v46, %v3641_v39 }
 0x217   : > { %1258 = vadd.xlane.f32.xlu0 %v1257_v11 }
 0x21c   : > { %1249 = vadd.xlane.f32.xlu1 %v1248_v15  ;;  %v848_v15 = vrot.slane %v834_v53, %v3641_v39 }
 0x220   : > { %1255 = vadd.xlane.f32.xlu1 %v1254_v18 }
 0x25c   : > { %v904_v21 = vpop.permute.xlu1 %903 }
 0x260   : > { %v906_v22 = vpop.permute.xlu0 %905  ;;  %v908_v23 = vpop.permute.xlu1 %907 }
 0x261   : > { %v913_v24 = vcombine.low %v902_v19, %v906_v22  ;;  %v914_v25 = vcombine.high %v902_v19, %v906_v22  ;;  %v929_v26 = vcombine.low %v904_v21, %v908_v23  ;;  %v930_v28 = vcombine.high %v904_v21, %v908_v23 }
 0x262   : > { %v881_v23 = vcombine.low %v848_v15, %v864_v7 }
 0x263   : > { %v921_v32 = vrot.slane %v913_v24, %v3641_v39  ;;  %v928_v33 = vrot.slane %v914_v25, %v3641_v39  ;;  %v937_v34 = vrot.slane %v929_v26, %v3641_v39  ;;  %v944_v35 = vrot.slane %v930_v28, %v3641_v39 }
 0x264   : > { %v882_v24 = vcombine.high %v848_v15, %v864_v7 }
 0x265   : > { %v945_v47 = vcombine.low %v921_v32, %v937_v34  ;;  %v961_v48 = vcombine.low %v928_v33, %v944_v35  ;;  %v946_v55 = vcombine.high %v921_v32, %v937_v34  ;;  %v962_v57 = vcombine.high %v928_v33, %v944_v35 }
 0x266   : > { %v986_v36 = vpop.permute.xlu0 %985  ;;  %v984_v41 = vpop.permute.xlu1 %983 }
 0x267   : > { %v993_v43 = vcombine.low %v982_v20, %v986_v36  ;;  %v994_v44 = vcombine.high %v982_v20, %v986_v36  ;;  %v3730_v8 = vrot.slane %v945_v47, %v3658_v54  ;;  %v3733_v9 = vrot.slane %v961_v48, %v3658_v54 }
 0x268   : > { %v3738_v17 = vrot.slane %v946_v55, %v3658_v54  ;;  %v3741_v18 = vrot.slane %v962_v57, %v3658_v54 }
 0x269   : > { %v1001_v63 = vrot.slane %v993_v43, %v3641_v39  ;;  %v1008_v2 = vrot.slane %v994_v44, %v3641_v39  ;;  %v1379_v25 = vmul.f32 %v3733_v9, %v3733_v9  ;;  %v1375_v26 = vmul.f32 %v3730_v8, %v3730_v8 }
 0x26a   : > { %v988_v49 = vpop.permute.xlu1 %987  ;;  %v1381_v35 = vmul.f32 %v3741_v18, %v3741_v18  ;;  %v1377_v36 = vmul.f32 %v3738_v17, %v3738_v17  ;;  %v3781_v45 = vcombine.high %v3738_v17, %v4451_v0  ;;  %v3785_v46 = vcombine.high %v3730_v8, %v4451_v0 }
 0x26b   : > { %v1009_v50 = vcombine.low %v984_v41, %v988_v49  ;;  %v1010_v51 = vcombine.high %v984_v41, %v988_v49  ;;  %v3810_v7 = vcombine.high %v3733_v9, %v4451_v0 }
 0x26d   : > { %v1017_v4 = vrot.slane %v1009_v50, %v3641_v39  ;;  %v1024_v5 = vrot.slane %v1010_v51, %v3641_v39  ;;  %v3792_v50 = vrot.slane %v881_v23, %v3658_v54 }
 0x26f   : > { %v1025_v10 = vcombine.low %v1001_v63, %v1017_v4  ;;  %v1026_v11 = vcombine.high %v1001_v63, %v1017_v4  ;;  %v1041_v12 = vcombine.low %v1008_v2, %v1024_v5  ;;  %v1042_v13 = vcombine.high %v1008_v2, %v1024_v5 }
 0x270   : > { %v804_v63 = vcombine.high %v3719_v52, %v786_v6  ;;  %v3802_v2 = vrot.slane %v803_v14, %v3658_v54  ;;  %v1378_v4 = vmul.f32 %v3781_v45, %v3781_v45  ;;  %v1376_v5 = vmul.f32 %v3785_v46, %v3785_v46 }
 0x271   : > { %v3744_v19 = vrot.slane %v1025_v10, %v3658_v54  ;;  %v3747_v20 = vrot.slane %v1026_v11, %v3658_v54  ;;  %v3750_v21 = vrot.slane %v1041_v12, %v3658_v54  ;;  %v3753_v22 = vrot.slane %v1042_v13, %v3658_v54 }
 0x272   : > { %v1235_v52 = vmul.f32 %v3792_v50, %v3792_v50  ;;  %v3821_v11 = vrot.slane %v882_v24, %v3658_v54  ;;  %v1227_v23 = vmul.f32 %v3802_v2, %v3802_v2  ;;  %v3834_v24 = vcombine.high %v3741_v18, %v4451_v0 }
 0x273   : > { %v1387_v28 = vmul.f32 %v3750_v21, %v3750_v21  ;;  %v1383_v32 = vmul.f32 %v3744_v19, %v3744_v19  ;;  %v1389_v33 = vmul.f32 %v3753_v22, %v3753_v22  ;;  %v1385_v34 = vmul.f32 %v3747_v20, %v3747_v20 }
 0x274   : > { %v3773_v41 = vcombine.high %v3747_v20, %v4451_v0  ;;  %v3777_v42 = vcombine.high %v3744_v19, %v4451_v0  ;;  %v3789_v49 = vcombine.high %v3750_v21, %v4451_v0  ;;  %v3818_v6 = vcombine.high %v3753_v22, %v4451_v0 }
 0x275   : > { %v1395_v43 = vadd.f32 %v1387_v28, %v1379_v25  ;;  %v1391_v44 = vadd.f32 %v1383_v32, %v1375_v26  ;;  %v1397_v47 = vadd.f32 %v1389_v33, %v1381_v35  ;;  %v1393_v48 = vadd.f32 %v1385_v34, %v1377_v36 }
 0x276   : > { %v1386_v55 = vmul.f32 %v3773_v41, %v3773_v41  ;;  %v1384_v57 = vmul.f32 %v3777_v42, %v3777_v42  ;;  %v1388_v10 = vmul.f32 %v3789_v49, %v3789_v49  ;;  %v3828_v25 = vrot.slane %v804_v63, %v3658_v54 }
 0x277   : > { %v1411_v51 = vsel %vm1247_vm2, %v1395_v43, 0.0  ;;  %v1399_v53 = vsel %vm1247_vm2, %v1391_v44, 0.0  ;;  %v1417_v12 = vsel %vm1247_vm2, %v1397_v47, 0.0  ;;  %v1405_v13 = vsel %vm1247_vm2, %v1393_v48, 0.0 }
 0x278   : > { %1412 = vadd.xlane.f32.xlu1 %v1411_v51  ;;  %1400 = vadd.xlane.f32.xlu0 %v1399_v53  ;;  %v1394_v14 = vadd.f32 %v1386_v55, %v1378_v4  ;;  %v1392_v15 = vadd.f32 %v1384_v57, %v1376_v5  ;;  %v1380_v26 = vmul.f32 %v3810_v7, %v3810_v7 }
 0x279   : > { %v1243_v28 = vadd.f32 %v1235_v52, %v1227_v23  ;;  %v1237_v32 = vmul.f32 %v3821_v11, %v3821_v11  ;;  %v3840_v33 = vcombine.high %v3792_v50, %v4451_v0  ;;  %v1390_v43 = vmul.f32 %v3818_v6, %v3818_v6 }
 0x27a   : > { %v1408_v34 = vsel %vm1247_vm2, %v1394_v14, 0.0  ;;  %v1402_v35 = vsel %vm1247_vm2, %v1392_v15, 0.0  ;;  %v1396_v36 = vadd.f32 %v1388_v10, %v1380_v26  ;;  %v1229_v44 = vmul.f32 %v3828_v25, %v3828_v25 }
 0x27b   : > { %v1382_v47 = vmul.f32 %v3834_v24, %v3834_v24  ;;  %v3852_v48 = vcombine.high %v3802_v2, %v4451_v0  ;;  %v3856_v53 = vcombine.high %v3821_v11, %v4451_v0  ;;  %v1260_v57 = vsel %vm1247_vm2, %v1243_v28, 0.0 }
 0x27c   : > { %1418 = vadd.xlane.f32.xlu1 %v1417_v12  ;;  %1406 = vadd.xlane.f32.xlu0 %v1405_v13  ;;  %v1245_v51 = vadd.f32 %v1237_v32, %v1229_v44  ;;  %v1414_v55 = vsel %vm1247_vm2, %v1396_v36, 0.0  ;;  %v1236_v4 = vmul.f32 %v3840_v33, %v3840_v33  ;;  %v3866_v10 = vcombine.high %v3828_v25, %v4451_v0 }
 0x27d   : > { %v1398_v63 = vadd.f32 %v1390_v43, %v1382_v47  ;;  %v1228_v5 = vmul.f32 %v3852_v48, %v3852_v48  ;;  %v1238_v14 = vmul.f32 %v3856_v53, %v3856_v53 }
 0x27e   : > { %v1266_v12 = vsel %vm1247_vm2, %v1245_v51, 0.0  ;;  %v1230_v15 = vmul.f32 %v3866_v10, %v3866_v10 }
 0x27f   : > { %v1420_v52 = vsel %vm1247_vm2, %v1398_v63, 0.0  ;;  %v1244_v13 = vadd.f32 %v1236_v4, %v1228_v5 }
 0x280   : > { %1409 = vadd.xlane.f32.xlu0 %v1408_v34  ;;  %1403 = vadd.xlane.f32.xlu1 %v1402_v35  ;;  %v1246_v26 = vadd.f32 %v1238_v14, %v1230_v15 }
 0x281   : > { %v1263_v23 = vsel %vm1247_vm2, %v1244_v13, 0.0 }
 0x282   : > { %v1269_v28 = vsel %vm1247_vm2, %v1246_v26, 0.0 }
 0x284   : > { %1415 = vadd.xlane.f32.xlu0 %v1414_v55  ;;  %1261 = vadd.xlane.f32.xlu1 %v1260_v57 }
 0x288   : > { %1421 = vadd.xlane.f32.xlu0 %v1420_v52  ;;  %1267 = vadd.xlane.f32.xlu1 %v1266_v12  ;;  %v3879_v52 = vld [vmem:[%s4426_s8] ss:$0 sm:$0xff] }
 0x289   : > { %v3884_v12 = vld [vmem:[%s4486_s16] ss:$0 sm:$0xff]  ;;  %s4380_s16 = scalar_lea.hbm %s4495_s26, %s2770_s3 }
 0x28c   : > { %1264 = vadd.xlane.f32.xlu0 %v1263_v23 }
 0x290   : > { %1270 = vadd.xlane.f32.xlu0 %v1269_v28 }
 0x29c   : > { %v1253_v32 = vpop.xlane.xlu0 %1252 }
 0x29d   : > { %v1274_v34 = vmul.f32 0.125, %v1253_v32 }
 0x29f   : > { %v1282_v35 = vadd.f32 1e-06, %v1274_v34 }
 0x2a0   : > { %v1259_v36 = vpop.xlane.xlu0 %1258 }
 0x2a1   : > { %2978 = vrsqrt.f32 %v1282_v35  ;;  %v1276_v43 = vmul.f32 0.125, %v1259_v36 }
 0x2a3   : > { %v1284_v44 = vadd.f32 1e-06, %v1276_v43 }
 0x2a5   : > { %2980 = vrsqrt.f32 %v1284_v44  ;;  %v1250_v47 = vpop.xlane.xlu1 %1249 }
 0x2a6   : > { %v1273_v51 = vmul.f32 0.125, %v1250_v47 }
 0x2a8   : > { %v1281_v55 = vadd.f32 1e-06, %v1273_v51 }
 0x2a9   : > { %v1256_v57 = vpop.xlane.xlu1 %1255 }
 0x2aa   : > { %2982 = vrsqrt.f32 %v1281_v55  ;;  %v1275_v63 = vmul.f32 0.125, %v1256_v57 }
 0x2ac   : > { %v1283_v4 = vadd.f32 1e-06, %v1275_v63 }
 0x2ae   : > { %v2979_v5 = vpop.eup %2978  ;;  %2984 = vrsqrt.f32 %v1283_v4 }
 0x2af   : > { %v1298_v13 = vmul.f32 %v2979_v5, %v3675_v61  ;;  %v1306_v14 = vmul.f32 %v2979_v5, %v3668_v59 }
 0x2b1   : > { %v1350_v15 = vmul.f32 %v3884_v12, %v1298_v13  ;;  %v1358_v23 = vmul.f32 %v3879_v52, %v1306_v14  ;;  %v3891_v26 = vmul.f32 %v3879_v52, %v1298_v13  ;;  %v3894_v28 = vmul.f32 %v3884_v12, %v1306_v14 }
 0x2b2   : > { %v2981_v32 = vpop.eup %2980 }
 0x2b3   : > { %v1366_v34 = vadd.f32 %v1358_v23, %v1350_v15  ;;  %v1300_v35 = vmul.f32 %v2981_v32, %v3690_v3  ;;  %v1308_v36 = vmul.f32 %v2981_v32, %v3684_v1  ;;  %v1342_v61 = vsub.f32 %v3891_v26, %v3894_v28 }
 0x2b5   : > { %v1532_v59 = vmul.f32 0.35355338, %v1366_v34  ;;  %v1352_v43 = vmul.f32 %v3884_v12, %v1300_v35  ;;  %v1360_v44 = vmul.f32 %v3879_v52, %v1308_v36  ;;  %v3903_v47 = vmul.f32 %v3879_v52, %v1300_v35 }
 0x2b6   : > { %v3906_v51 = vmul.f32 %v3884_v12, %v1308_v36 }
 0x2b7   : > { %v2983_v55 = vpop.eup %2982  ;;  %1549 = vrot.lane.b32.xlu1 %v1532_v59, %s3282_s14  ;;  %v1368_v3 = vadd.f32 %v1360_v44, %v1352_v43 }
 0x2b8   : > { %v1297_v1 = vmul.f32 %v2983_v55, %v3664_v58  ;;  %v1305_v57 = vmul.f32 %v2983_v55, %v3661_v56 }
 0x2b9   : > { %v1534_v4 = vmul.f32 0.35355338, %v1368_v3 }
 0x2ba   : > { %v1349_v5 = vmul.f32 %v3884_v12, %v1297_v1  ;;  %v1357_v13 = vmul.f32 %v3879_v52, %v1305_v57  ;;  %v3916_v14 = vmul.f32 %v3884_v12, %v1305_v57  ;;  %v3920_v23 = vmul.f32 %v3879_v52, %v1297_v1 }
 0x2bb   : > { %v2985_v15 = vpop.eup %2984  ;;  %1553 = vrot.lane.b32.xlu1 %v1534_v4, %s3282_s14 }
 0x2bc   : > { %v1365_v58 = vadd.f32 %v1357_v13, %v1349_v5  ;;  %v1299_v56 = vmul.f32 %v2985_v15, %v3678_v62  ;;  %v1307_v32 = vmul.f32 %v2985_v15, %v3671_v60 }
 0x2be   : > { %v1531_v35 = vmul.f32 0.35355338, %v1365_v58  ;;  %v1351_v36 = vmul.f32 %v3884_v12, %v1299_v56  ;;  %v1359_v59 = vmul.f32 %v3879_v52, %v1307_v32  ;;  %v3929_v43 = vmul.f32 %v3884_v12, %v1307_v32 }
 0x2bf   : > { %v3932_v44 = vmul.f32 %v3879_v52, %v1299_v56 }
 0x2c0   : > { %1547 = vrot.lane.b32.xlu0 %v1531_v35, %s3282_s14  ;;  %v1367_v55 = vadd.f32 %v1359_v59, %v1351_v36 }
 0x2c2   : > { %v1533_v62 = vmul.f32 0.35355338, %v1367_v55 }
 0x2c4   : > { %1551 = vrot.lane.b32.xlu0 %v1533_v62, %s3282_s14 }
 0x301   : > { %v1401_v3 = vpop.xlane.xlu0 %1400  ;;  %v1413_v1 = vpop.xlane.xlu1 %1412 }
 0x302   : > { %v1423_v57 = vmul.f32 0.125, %v1401_v3  ;;  %v1427_v4 = vmul.f32 0.125, %v1413_v1 }
 0x304   : > { %v1431_v5 = vadd.f32 1e-06, %v1423_v57  ;;  %v1435_v13 = vadd.f32 1e-06, %v1427_v4 }
 0x305   : > { %v1407_v15 = vpop.xlane.xlu0 %1406  ;;  %v1419_v58 = vpop.xlane.xlu1 %1418 }
 0x306   : > { %2986 = vrsqrt.f32 %v1431_v5  ;;  %v1425_v56 = vmul.f32 0.125, %v1407_v15  ;;  %v1429_v32 = vmul.f32 0.125, %v1419_v58 }
 0x307   : > { %2988 = vrsqrt.f32 %v1435_v13 }
 0x308   : > { %v1433_v35 = vadd.f32 1e-06, %v1425_v56  ;;  %v1437_v36 = vadd.f32 1e-06, %v1429_v32 }
 0x309   : > { %v1410_v59 = vpop.xlane.xlu0 %1409  ;;  %v1404_v0 = vpop.xlane.xlu1 %1403 }
 0x30a   : > { %2990 = vrsqrt.f32 %v1433_v35  ;;  %v1426_v55 = vmul.f32 0.125, %v1410_v59  ;;  %v1424_v60 = vmul.f32 0.125, %v1404_v0  ;;  %v3941_v0 = vld [vmem:[%s4487_s28] ss:$0 sm:$0xff]  ;;  %s3194_s28 = scalar_lea.vmem %s3193_s20, 256 }
 0x30b   : > { %2992 = vrsqrt.f32 %v1437_v36  ;;  %p3196_p4 = scmp.lt.s32.totalorder %s3194_s28, %s3188_s11 }
 0x30c   : > { %v1434_v62 = vadd.f32 1e-06, %v1426_v55  ;;  %v1432_v34 = vadd.f32 1e-06, %v1424_v60  ;;  %v3946_v60 = vld [vmem:[%s4488_s30] ss:$0 sm:$0xff] }
 0x30d   : > { %v1416_v3 = vpop.xlane.xlu0 %1415  ;;  %v1262_v1 = vpop.xlane.xlu1 %1261  ;;  %p3197_p8 = por %p3196_p4, %p3195_p6 }
 0x30e   : > { %2994 = vrsqrt.f32 %v1434_v62  ;;  %v1428_v57 = vmul.f32 0.125, %v1416_v3  ;;  %v1277_v4 = vmul.f32 0.125, %v1262_v1 }
 0x30f   : > { %2996 = vrsqrt.f32 %v1432_v34  ;;  %p3198_p11 = pnand %p3197_p8, %p3191_p3 }
 0x310   : > { %v1436_v5 = vadd.f32 1e-06, %v1428_v57  ;;  %v1285_v15 = vadd.f32 1e-06, %v1277_v4  ;;  %v3955_v57 = vmul.f32 0.35355338, %v1342_v61 }
 0x311   : > { %v1422_v58 = vpop.xlane.xlu0 %1421  ;;  %v1268_v13 = vpop.xlane.xlu1 %1267 }
 0x312   : > { %2998 = vrsqrt.f32 %v1436_v5  ;;  %v1430_v56 = vmul.f32 0.125, %v1422_v58  ;;  %v1279_v32 = vmul.f32 0.125, %v1268_v13 }
 0x313   : > { %v2987_v63 = vpop.eup %2986  ;;  %3000 = vrsqrt.f32 %v1285_v15 }
 0x314   : > { %v2989_v34 = vpop.eup %2988  ;;  %v1438_v35 = vadd.f32 1e-06, %v1430_v56  ;;  %v1287_v36 = vadd.f32 1e-06, %v1279_v32  ;;  %v1447_v59 = vmul.f32 %v2987_v63, %v3730_v8  ;;  %v1455_v55 = vmul.f32 %v2987_v63, %v3744_v19 }
 0x315   : > { %v1265_v62 = vpop.xlane.xlu0 %1264  ;;  %v1451_v3 = vmul.f32 %v2989_v34, %v3733_v9  ;;  %v1459_v1 = vmul.f32 %v2989_v34, %v3750_v21 }
 0x316   : > { %3002 = vrsqrt.f32 %v1438_v35  ;;  %v1278_v4 = vmul.f32 0.125, %v1265_v62  ;;  %v1499_v5 = vmul.f32 %v3946_v60, %v1447_v59  ;;  %v1507_v15 = vmul.f32 %v3941_v0, %v1455_v55 }
 0x317   : > { %v2991_v58 = vpop.eup %2990  ;;  %3004 = vrsqrt.f32 %v1287_v36  ;;  %v1503_v8 = vmul.f32 %v3946_v60, %v1451_v3  ;;  %v1511_v19 = vmul.f32 %v3941_v0, %v1459_v1  ;;  %v3962_v9 = vmul.f32 %v3946_v60, %v1459_v1 }
 0x318   : > { %v2993_v21 = vpop.eup %2992  ;;  %v1286_v63 = vadd.f32 1e-06, %v1278_v4  ;;  %v1515_v26 = vadd.f32 %v1507_v15, %v1499_v5  ;;  %v1449_v28 = vmul.f32 %v2991_v58, %v3738_v17  ;;  %v1457_v61 = vmul.f32 %v2991_v58, %v3747_v20 }
 0x319   : > { %v1271_v13 = vpop.xlane.xlu0 %1270  ;;  %v1519_v56 = vadd.f32 %v1511_v19, %v1503_v8  ;;  %v1453_v32 = vmul.f32 %v2993_v21, %v3741_v18  ;;  %v1461_v34 = vmul.f32 %v2993_v21, %v3753_v22  ;;  %v3969_v35 = vmul.f32 %v3941_v0, %v1451_v3 }
 0x31a   : > { %3006 = vrsqrt.f32 %v1286_v63  ;;  %v1280_v36 = vmul.f32 0.125, %v1271_v13  ;;  %1660 = vrot.lane.b32.xlu1 %v1515_v26, %s3282_s14  ;;  %v1501_v62 = vmul.f32 %v3946_v60, %v1449_v28  ;;  %v1509_v1 = vmul.f32 %v3941_v0, %v1457_v61 }
 0x31b   : > { %v2995_v17 = vpop.eup %2994  ;;  %1668 = vrot.lane.b32.xlu0 %v1519_v56, %s3282_s14  ;;  %v1505_v20 = vmul.f32 %v3946_v60, %v1453_v32  ;;  %v1513_v18 = vmul.f32 %v3941_v0, %v1461_v34  ;;  %v1495_v22 = vsub.f32 %v3969_v35, %v3962_v9  ;;  %v3980_v3 = vmul.f32 %v3941_v0, %v1447_v59 }
 0x31c   : > { %v2997_v4 = vpop.eup %2996  ;;  %v1288_v5 = vadd.f32 1e-06, %v1280_v36  ;;  %v1517_v15 = vadd.f32 %v1509_v1, %v1501_v62  ;;  %v1450_v58 = vmul.f32 %v2995_v17, %v3781_v45  ;;  %v1458_v8 = vmul.f32 %v2995_v17, %v3773_v41 }
 0x31d   : > { %v1521_v19 = vadd.f32 %v1513_v18, %v1505_v20  ;;  %v1448_v21 = vmul.f32 %v2997_v4, %v3785_v46  ;;  %v1456_v63 = vmul.f32 %v2997_v4, %v3777_v42  ;;  %v3987_v26 = vmul.f32 %v3946_v60, %v1455_v55 }
 0x31e   : > { %3008 = vrsqrt.f32 %v1288_v5  ;;  %1664 = vrot.lane.b32.xlu1 %v1517_v15, %s3282_s14  ;;  %v1502_v59 = vmul.f32 %v3946_v60, %v1450_v58  ;;  %v1510_v13 = vmul.f32 %v3941_v0, %v1458_v8  ;;  %v3993_v56 = vmul.f32 %v3946_v60, %v1461_v34 }
 0x31f   : > { %v2999_v45 = vpop.eup %2998  ;;  %1672 = vrot.lane.b32.xlu0 %v1521_v19, %s3282_s14  ;;  %v1500_v41 = vmul.f32 %v3946_v60, %v1448_v21  ;;  %v1508_v42 = vmul.f32 %v3941_v0, %v1456_v63  ;;  %v1491_v46 = vsub.f32 %v3980_v3, %v3987_v26  ;;  %v4001_v55 = vmul.f32 %v3941_v0, %v1453_v32 }
 0x320   : > { %v3001_v36 = vpop.eup %3000  ;;  %v1518_v62 = vadd.f32 %v1510_v13, %v1502_v59  ;;  %v1452_v1 = vmul.f32 %v2999_v45, %v3810_v7  ;;  %v1460_v34 = vmul.f32 %v2999_v45, %v3789_v49  ;;  %v4006_v17 = vmul.f32 %v3941_v0, %v1449_v28 }
 0x321   : > { %v1516_v20 = vadd.f32 %v1508_v42, %v1500_v41  ;;  %v1301_v18 = vmul.f32 %v3001_v36, %v3802_v2  ;;  %v1309_v4 = vmul.f32 %v3001_v36, %v3792_v50  ;;  %v1497_v5 = vsub.f32 %v4001_v55, %v3993_v56 }
 0x322   : > { %1666 = vrot.lane.b32.xlu1 %v1518_v62, %s3282_s14  ;;  %v1504_v32 = vmul.f32 %v3946_v60, %v1452_v1  ;;  %v1512_v15 = vmul.f32 %v3941_v0, %v1460_v34  ;;  %v4016_v49 = vmul.f32 %v3946_v60, %v1457_v61  ;;  %v4019_v7 = vmul.f32 %v3946_v60, %v1456_v63 }
 0x323   : > { %v3003_v28 = vpop.eup %3002  ;;  %1662 = vrot.lane.b32.xlu0 %v1516_v20, %s3282_s14  ;;  %v1353_v50 = vmul.f32 %v3884_v12, %v1301_v18  ;;  %v1361_v2 = vmul.f32 %v3879_v52, %v1309_v4  ;;  %v4025_v19 = vmul.f32 %v3941_v0, %v1448_v21  ;;  %v4028_v59 = vmul.f32 %v3941_v0, %v1450_v58 }
 0x324   : > { %v3005_v13 = vpop.eup %3004  ;;  %v1520_v45 = vadd.f32 %v1512_v15, %v1504_v32  ;;  %v1454_v61 = vmul.f32 %v3003_v28, %v3834_v24  ;;  %v1462_v63 = vmul.f32 %v3003_v28, %v3818_v6  ;;  %v1493_v41 = vsub.f32 %v4006_v17, %v4016_v49 }
 0x325   : > { %v1369_v42 = vadd.f32 %v1361_v2, %v1353_v50  ;;  %v1303_v36 = vmul.f32 %v3005_v13, %v3828_v25  ;;  %v1311_v62 = vmul.f32 %v3005_v13, %v3821_v11  ;;  %v4042_v24 = vmul.f32 %v3946_v60, %v1458_v8 }
 0x326   : > { %1670 = vrot.lane.b32.xlu1 %v1520_v45, %s3282_s14  ;;  %v1506_v58 = vmul.f32 %v3946_v60, %v1454_v61  ;;  %v1514_v20 = vmul.f32 %v3941_v0, %v1462_v63  ;;  %v4045_v6 = vmul.f32 %v3941_v0, %v1452_v1  ;;  %v4050_v28 = vmul.f32 %v3946_v60, %v1460_v34 }
 0x327   : > { %v3007_v32 = vpop.eup %3006  ;;  %v1535_v15 = vmul.f32 0.35355338, %v1369_v42  ;;  %v1355_v25 = vmul.f32 %v3884_v12, %v1303_v36  ;;  %v1363_v11 = vmul.f32 %v3879_v52, %v1311_v62  ;;  %v1494_v8 = vsub.f32 %v4028_v59, %v4042_v24 }
 0x328   : > { %v1522_v50 = vadd.f32 %v1514_v20, %v1506_v58  ;;  %v1302_v2 = vmul.f32 %v3007_v32, %v3852_v48  ;;  %v1310_v13 = vmul.f32 %v3007_v32, %v3840_v33  ;;  %v1496_v42 = vsub.f32 %v4045_v6, %v4050_v28 }
 0x329   : > { %1555 = vrot.lane.b32.xlu0 %v1535_v15, %s3282_s14  ;;  %v1550_v1 = vpop.permute.xlu1 %1549  ;;  %v1371_v45 = vadd.f32 %v1363_v11, %v1355_v25  ;;  %v4060_v21 = vmul.f32 %v3884_v12, %v1309_v4  ;;  %v4063_v34 = vmul.f32 %v3879_v52, %v1301_v18  ;;  %v4489_v33 = vsub.f32 %v3903_v47, %v3906_v51 }
 0x32a   : > { %1674 = vrot.lane.b32.xlu1 %v1522_v50, %s3282_s14  ;;  %v1354_v58 = vmul.f32 %v3884_v12, %v1302_v2  ;;  %v1362_v20 = vmul.f32 %v3879_v52, %v1310_v13  ;;  %v4072_v32 = vmul.f32 %v3941_v0, %v1454_v61  ;;  %v4077_v18 = vmul.f32 %v3946_v60, %v1462_v63 }
 0x32b   : > { %v1526_v48 = vmul.f32 0.35355338, %v4489_v33  ;;  %v3009_v15 = vpop.eup %3008  ;;  %v1537_v25 = vmul.f32 0.35355338, %v1371_v45  ;;  %v1345_v4 = vsub.f32 %v4063_v34, %v4060_v21  ;;  %v4080_v11 = vmul.f32 %v3884_v12, %v1311_v62 }
 0x32c   : > { %v1370_v47 = vadd.f32 %v1362_v20, %v1354_v58  ;;  %v1304_v51 = vmul.f32 %v3009_v15, %v3866_v10  ;;  %v1312_v50 = vmul.f32 %v3009_v15, %v3856_v53  ;;  %v4085_v33 = vmul.f32 %v3879_v52, %v1303_v36 }
 0x32d   : > { %v1573_v0 = vsel %vm1571_vm3, %v3955_v57, %v1550_v1  ;;  %1559 = vrot.lane.b32.xlu0 %v1537_v25, %s3282_s14  ;;  %v1554_v61 = vpop.permute.xlu1 %1553  ;;  %v1498_v60 = vsub.f32 %v4072_v32, %v4077_v18  ;;  %v4093_v63 = vmul.f32 %v3879_v52, %v1302_v2  ;;  %v4096_v62 = vmul.f32 %v3884_v12, %v1310_v13 }
 0x32e   : > { %v1575_v53 = vsel %vm1571_vm3, %v1526_v48, %v1554_v61  ;;  %v1536_v10 = vmul.f32 0.35355338, %v1370_v47  ;;  %v1356_v36 = vmul.f32 %v3884_v12, %v1304_v51  ;;  %v1364_v45 = vmul.f32 %v3879_v52, %v1312_v50 }
 0x32f   : > { %v1588_v57 = vcombine.low %v1573_v0, %v1575_v53  ;;  %v1347_v1 = vsub.f32 %v4085_v33, %v4080_v11  ;;  %v1346_v58 = vsub.f32 %v4093_v63, %v4096_v62  ;;  %v4106_v2 = vmul.f32 %v3879_v52, %v1304_v51 }
 0x330   : > { %1557 = vrot.lane.b32.xlu1 %v1536_v10, %s3282_s14  ;;  %v1372_v13 = vadd.f32 %v1364_v45, %v1356_v36  ;;  %v4110_v48 = vmul.f32 %v3884_v12, %v1312_v50  ;;  %v4490_v52 = vsub.f32 %v3920_v23, %v3916_v14  ;;  %v4491_v12 = vsub.f32 %v3932_v44, %v3929_v43 }
 0x331   : > { %1143 = vrot.lane.b32.xlu0 %v3637_v38, %s3283_s27  ;;  %v4132_v14 = vrot.slane %v1588_v57, %v3641_v39  ;;  %v4492_v49 = vsub.f32 %v4025_v19, %v4019_v7  ;;  %v1527_v7 = vmul.f32 0.35355338, %v1345_v4 }
 0x332   : > { %v1548_v20 = vpop.permute.xlu0 %1547  ;;  %v1538_v32 = vmul.f32 0.35355338, %v1372_v13  ;;  %v1348_v15 = vsub.f32 %v4106_v2, %v4110_v48  ;;  %v1523_v25 = vmul.f32 0.35355338, %v4490_v52  ;;  %v1525_v18 = vmul.f32 0.35355338, %v4491_v12 }
 0x334   : > { %1561 = vrot.lane.b32.xlu1 %v1538_v32, %s3282_s14  ;;  %v1572_v38 = vsel %vm1571_vm3, %v1523_v25, %v1548_v20  ;;  %v1530_v48 = vmul.f32 0.35355338, %v1348_v15 }
 0x335   : > { %1061 = vrot.lane.b32.xlu0 %v3609_v16, %s3283_s27 }
 0x336   : > { %v1552_v11 = vpop.permute.xlu0 %1551 }
 0x337   : > { %v1574_v47 = vsel %vm1571_vm3, %v1525_v18, %v1552_v11 }
 0x338   : > { %v1580_v51 = vcombine.low %v1572_v38, %v1574_v47  ;;  %1141 = vrot.lane.b32.xlu1 %v3618_v27, %s3283_s27 }
 0x339   : > { %1065 = vrot.lane.b32.xlu0 %v3631_v31, %s3283_s27 }
 0x33a   : > { %v4135_v16 = vrot.slane %v1580_v51, %v3641_v39 }
 0x33c   : > { %v1612_v23 = vcombine.low %v4135_v16, %v4132_v14  ;;  %v1613_v43 = vcombine.high %v4135_v16, %v4132_v14  ;;  %1145 = vrot.lane.b32.xlu1 %v3635_v37, %s3283_s27 }
 0x340   : > { %1147 = vrot.lane.b32.xlu1 %v3643_v40, %s3283_s27 }
 0x344   : > { %1063 = vrot.lane.b32.xlu1 %v3626_v29, %s3283_s27 }
 0x38c   : > { %v1661_v27 = vpop.permute.xlu1 %1660 }
 0x38d   : > { %v1669_v31 = vpop.permute.xlu0 %1668  ;;  %v1684_v50 = vsel %vm1571_vm3, %v1491_v46, %v1661_v27 }
 0x38e   : > { %v1688_v40 = vsel %vm1571_vm3, %v1495_v22, %v1669_v31 }
 0x390   : > { %v1665_v44 = vpop.permute.xlu1 %1664 }
 0x391   : > { %v1673_v33 = vpop.permute.xlu0 %1672  ;;  %v1686_v37 = vsel %vm1571_vm3, %v1493_v41, %v1665_v44 }
 0x392   : > { %v1690_v29 = vsel %vm1571_vm3, %v1497_v5, %v1673_v33  ;;  %v1692_v0 = vcombine.low %v1684_v50, %v1686_v37  ;;  %v4493_v50 = vmov 0.0   ;;  %v1620_v33 = vrot.slane %v1612_v23, %v3658_v54 }
 0x393   : > { %v1708_v3 = vcombine.low %v1688_v40, %v1690_v29  ;;  %v1627_v37 = vrot.slane %v1613_v43, %v3658_v54 }
 0x394   : > { %v1667_v26 = vpop.permute.xlu1 %1666  ;;  %v1699_v56 = vrot.slane %v1692_v0, %v3641_v39 }
 0x395   : > { %v1663_v46 = vpop.permute.xlu0 %1662  ;;  %v1687_v17 = vsel %vm1571_vm3, %v1494_v8, %v1667_v26  ;;  %v1529_v8 = vmul.f32 0.35355338, %v1347_v1  ;;  %v1715_v36 = vrot.slane %v1708_v3, %v3641_v39  ;;  %v1528_v1 = vmul.f32 0.35355338, %v1346_v58 }
 0x396   : > { %v1685_v9 = vsel %vm1571_vm3, %v4492_v49, %v1663_v46 }
 0x397   : > { %v1700_v35 = vcombine.low %v1685_v9, %v1687_v17 }
 0x398   : > { %v1671_v22 = vpop.permute.xlu1 %1670 }
 0x399   : > { %v1707_v55 = vrot.slane %v1700_v35, %v3641_v39  ;;  %v1689_v59 = vsel %vm1571_vm3, %v1496_v42, %v1671_v22 }
 0x39b   : > { %v1724_v5 = vcombine.low %v1699_v56, %v1707_v55  ;;  %v1725_v41 = vcombine.high %v1699_v56, %v1707_v55  ;;  %v1556_v61 = vpop.permute.xlu0 %1555 }
 0x39c   : > { %v1675_v53 = vpop.permute.xlu1 %1674  ;;  %v1576_v45 = vsel %vm1571_vm3, %v1527_v7, %v1556_v61 }
 0x39d   : > { %v1691_v24 = vsel %vm1571_vm3, %v1498_v60, %v1675_v53  ;;  %v1732_v60 = vrot.slane %v1724_v5, %v3658_v54  ;;  %v1739_v34 = vrot.slane %v1725_v41, %v3658_v54 }
 0x39e   : > { %v1716_v19 = vcombine.low %v1689_v59, %v1691_v24 }
 0x39f   : > { %v1560_v10 = vpop.permute.xlu0 %1559 }
 0x3a0   : > { %v1723_v57 = vrot.slane %v1716_v19, %v3641_v39  ;;  %v1578_v2 = vsel %vm1571_vm3, %v1529_v8, %v1560_v10 }
 0x3a1   : > { %v1596_v6 = vcombine.low %v1576_v45, %v1578_v2 }
 0x3a2   : > { %v1740_v28 = vcombine.low %v1715_v36, %v1723_v57  ;;  %v1741_v42 = vcombine.high %v1715_v36, %v1723_v57  ;;  %v1558_v13 = vpop.permute.xlu1 %1557 }
 0x3a3   : > { %v1577_v18 = vsel %vm1571_vm3, %v1528_v1, %v1558_v13  ;;  %v1603_v27 = vrot.slane %v1596_v6, %v3641_v39  ;;  %v1144_v22 = vpop.permute.xlu0 %1143 }
 0x3a4   : > { %v1748_v21 = vrot.slane %v1740_v28, %v3658_v54  ;;  %v1755_v4 = vrot.slane %v1741_v42, %v3658_v54 }
 0x3a6   : > { %v1562_v20 = vpop.permute.xlu1 %1561  ;;  %v1756_v32 = vcombine.low %v1732_v60, %v1748_v21  ;;  %v1757_v52 = vcombine.high %v1732_v60, %v1748_v21  ;;  %v1758_v25 = vcombine.low %v1739_v34, %v1755_v4  ;;  %v1759_v12 = vcombine.high %v1739_v34, %v1755_v4 }
 0x3a7   : > { %v1579_v11 = vsel %vm1571_vm3, %v1530_v48, %v1562_v20 }
 0x3a8   : > { %v1604_v38 = vcombine.low %v1577_v18, %v1579_v11  ;;  %v1760_v47 = vpack.c.bf16 %v1756_v32, %v1756_v32  ;;  %v1761_v51 = vpack.c.bf16 %v1757_v52, %v1757_v52  ;;  %v1762_v3 = vpack.c.bf16 %v1758_v25, %v1758_v25 }
 0x3a9   : > { %v1763_v26 = vpack.c.bf16 %v1759_v12, %v1759_v12 }
 0x3aa   : > { %v1611_v31 = vrot.slane %v1604_v38, %v3641_v39  ;;  %v4196_v63 = vpop.permute.xlu1 %1141  ;;  %v1881_v62 = vsel %vm1876_vm4, %v1760_v47, 0  ;;  %v1927_v58 = vsel %vm1876_vm4, %v1761_v51, 0  ;;  %v1973_v14 = vsel %vm1876_vm4, %v1762_v3, 0 }
 0x3ab   : > { %2823 = vmatpush3.bf16.xpose.msra.mxu1 %v1881_v62  ;;  %2829 = vmatpush3.bf16.xpose.msra.mxu0 %v1927_v58  ;;  %v2019_v16 = vsel %vm1876_vm4, %v1763_v26, 0 }
 0x3ac   : > { %v1628_v15 = vcombine.low %v1603_v27, %v1611_v31  ;;  %v1629_v44 = vcombine.high %v1603_v27, %v1611_v31  ;;  %2834 = vmatprep.subr.bf16.mxu1 %v4493_v50  ;;  %2840 = vmatprep.subr.bf16.mxu0 %v4493_v50 }
 0x3ae   : > { %v1636_v40 = vrot.slane %v1628_v15, %v3658_v54  ;;  %v1643_v29 = vrot.slane %v1629_v44, %v3658_v54  ;;  %v1146_v0 = vpop.permute.xlu1 %1145 }
 0x3af   : > { %v1154_v35 = vcombine.high %v4196_v63, %v1146_v0  ;;  %v1153_v42 = vcombine.low %v4196_v63, %v1146_v0 }
 0x3b0   : > { %v1644_v46 = vcombine.low %v1620_v33, %v1636_v40  ;;  %v1645_v17 = vcombine.high %v1620_v33, %v1636_v40  ;;  %v1646_v49 = vcombine.low %v1627_v37, %v1643_v29  ;;  %v1647_v9 = vcombine.high %v1627_v37, %v1643_v29 }
 0x3b1   : > { %v4218_v43 = vrot.slane %v1154_v35, %v3641_v39  ;;  %v1161_v48 = vrot.slane %v1153_v42, %v3641_v39 }
 0x3b2   : > { %v1648_v23 = vpack.c.bf16 %v1644_v46, %v1644_v46  ;;  %v1649_v56 = vpack.c.bf16 %v1645_v17, %v1645_v17  ;;  %v1148_v55 = vpop.permute.xlu1 %1147  ;;  %v1650_v53 = vpack.c.bf16 %v1646_v49, %v1646_v49  ;;  %v1651_v59 = vpack.c.bf16 %v1647_v9, %v1647_v9 }
 0x3b3   : > { %v1170_v5 = vcombine.high %v1144_v22, %v1148_v55  ;;  %v1169_v2 = vcombine.low %v1144_v22, %v1148_v55 }
 0x3b4   : > { %2825 = vmatmul.mubr.msk.bf16.vlgmr.msra.gmra.mxu1 %vm1876_vm4, %v1648_v23  ;;  %2831 = vmatmul.mubr.msk.bf16.vlgmr.msra.gmra.mxu0 %vm1876_vm4, %v1649_v56 }
 0x3b5   : > { %v4221_v41 = vrot.slane %v1170_v5, %v3641_v39  ;;  %2835 = vmatpush3.bf16.xpose.msra.mxu1 %v1973_v14  ;;  %2841 = vmatpush3.bf16.xpose.msra.mxu0 %v2019_v16  ;;  %v1177_v21 = vrot.slane %v1169_v2, %v3641_v39 }
 0x3b6   : > { %2836 = vmatprep.mubr.msk.bf16.mxu1 %vm3275_vm0, %v4493_v50  ;;  %2842 = vmatprep.mubr.msk.bf16.mxu0 %vm3275_vm0, %v4493_v50  ;;  %v1064_v15 = vpop.permute.xlu1 %1063 }
 0x3b7   : > { %v1202_v61 = vcombine.high %v4218_v43, %v4221_v41  ;;  %2846 = vmatprep.subr.bf16.mxu1 %v4493_v50  ;;  %2852 = vmatprep.subr.bf16.mxu0 %v4493_v50  ;;  %v1185_v52 = vcombine.low %v1161_v48, %v1177_v21  ;;  %v1186_v11 = vcombine.high %v1161_v48, %v1177_v21 }
 0x3b8   : > { %v1201_v47 = vcombine.low %v4218_v43, %v4221_v41 }
 0x3b9   : > { %v1193_v38 = vrot.slane %v1185_v52, %v3658_v54  ;;  %v1200_v27 = vrot.slane %v1186_v11, %v3658_v54 }
 0x3ba   : > { %v1209_v63 = vrot.slane %v1201_v47, %v3658_v54 }
 0x3bb   : > { %v1217_v51 = vcombine.high %v1193_v38, %v4493_v50  ;;  %v1218_v31 = vcombine.high %v1200_v27, %v4493_v50 }
 0x3bc   : > { %2837 = vmatmul.mubr.msk.bf16.vlgmr.msra.gmra.mxu1 %vm1876_vm4, %v1650_v53  ;;  %2843 = vmatmul.mubr.msk.bf16.vlgmr.msra.gmra.mxu0 %vm1876_vm4, %v1651_v59  ;;  %v1219_v62 = vcombine.high %v1209_v63, %v4493_v50 }
 0x3bd   : > { %2848 = vmatprep.mubr.msk.bf16.mxu1 %vm3275_vm0, %v4493_v50  ;;  %2854 = vmatprep.mubr.msk.bf16.mxu0 %vm3275_vm0, %v4493_v50 }
 0x474   : > { %v1917_v24 = vpop.f32.mrf.mxu1  ;;  %v1963_v7 = vpop.f32.mrf.mxu0 }
 0x475   : > { %v2061_v19 = vsel %vm1571_vm3, %v1917_v24, -inf  ;;  %v2064_v8 = vsel %vm1571_vm3, %v1963_v7, -inf }
 0x476   : > { %2062 = vmax.xlane.f32.xlu0 %v2061_v19  ;;  %v2826_v10 = vpop.f32.mrf.mxu1  ;;  %2065 = vmax.xlane.f32.xlu1 %v2064_v8  ;;  %v2832_v36 = vpop.f32.mrf.mxu0 }
 0x478   : > { %v1920_v45 = vpop.f32.mrf.mxu1  ;;  %v1966_v57 = vpop.f32.mrf.mxu0 }
 0x47a   : > { %v2827_v6 = vpop.f32.mrf.mxu1  ;;  %v2833_v28 = vpop.f32.mrf.mxu0 }
 0x47c   : > { %v2009_v13 = vpop.f32.mrf.mxu1  ;;  %v4240_v60 = vpop.f32.mrf.mxu0 }
 0x47d   : > { %v2067_v34 = vsel %vm1571_vm3, %v2009_v13, -inf  ;;  %v2070_v25 = vsel %vm1571_vm3, %v4240_v60, -inf }
 0x47e   : > { %2068 = vmax.xlane.f32.xlu0 %v2067_v34  ;;  %v2838_v4 = vpop.f32.mrf.mxu1  ;;  %v2844_v1 = vpop.f32.mrf.mxu0 }
 0x480   : > { %v2012_v20 = vpop.f32.mrf.mxu1  ;;  %v2058_v32 = vpop.f32.mrf.mxu0 }
 0x482   : > { %v2839_v12 = vpop.f32.mrf.mxu1  ;;  %2071 = vmax.xlane.f32.xlu0 %v2070_v25  ;;  %v2845_v18 = vpop.f32.mrf.mxu0 }
 0x487   : > { %1067 = vrot.lane.b32.xlu1 %v3629_v30, %s3283_s27  ;;  %v1062_v30 = vpop.permute.xlu0 %1061 }
 0x48b   : > { %1774 = vrot.lane.b32.xlu1 %v1217_v51, %s3282_s14  ;;  %v1066_v58 = vpop.permute.xlu0 %1065 }
 0x48c   : > { %v1073_v29 = vcombine.low %v1062_v30, %v1066_v58  ;;  %v1074_v0 = vcombine.high %v1062_v30, %v1066_v58 }
 0x48e   : > { %v1081_v9 = vrot.slane %v1073_v29, %v3641_v39  ;;  %v1088_v35 = vrot.slane %v1074_v0, %v3641_v39 }
 0x48f   : > { %1778 = vrot.lane.b32.xlu1 %v1218_v31, %s3282_s14 }
 0x493   : > { %1782 = vrot.lane.b32.xlu1 %v1219_v62, %s3282_s14 }
 0x498   : > { %1772 = vrot.lane.b32.xlu0 %v1193_v38, %s3282_s14 }
 0x49c   : > { %1776 = vrot.lane.b32.xlu0 %v1200_v27, %s3282_s14  ;;  %v1216_v27 = vrot.slane %v1202_v61, %v3658_v54 }
 0x49e   : > { %v1220_v31 = vcombine.high %v1216_v27, %v4493_v50 }
 0x4a0   : > { %1780 = vrot.lane.b32.xlu0 %v1209_v63, %s3282_s14 }
 0x4ff   : > { %v2063_v44 = vpop.xlane.xlu0 %2062  ;;  %v2066_v33 = vpop.xlane.xlu1 %2065 }
 0x500   : > { %v2073_v37 = vsub.f32 %v1917_v24, %v2063_v44  ;;  %v2074_v40 = vsub.f32 %v1963_v7, %v2066_v33 }
 0x502   : > { %v2077_v3 = vmul.f32 1.442695, %v2073_v37  ;;  %v2079_v26 = vmul.f32 1.442695, %v2074_v40 }
 0x503   : > { %v1068_v46 = vpop.permute.xlu1 %1067 }
 0x504   : > { %3010 = vpow2.f32 %v2077_v3  ;;  %v1089_v17 = vcombine.low %v1064_v15, %v1068_v46  ;;  %v1090_v49 = vcombine.high %v1064_v15, %v1068_v46 }
 0x505   : > { %3012 = vpow2.f32 %v2079_v26 }
 0x506   : > { %v1097_v22 = vrot.slane %v1089_v17, %v3641_v39  ;;  %v1104_v23 = vrot.slane %v1090_v49, %v3641_v39 }
 0x507   : > { %v2069_v56 = vpop.xlane.xlu0 %2068  ;;  %v1775_v55 = vpop.permute.xlu1 %1774 }
 0x508   : > { %v1105_v5 = vcombine.low %v1081_v9, %v1097_v22  ;;  %v1106_v14 = vcombine.high %v1081_v9, %v1097_v22  ;;  %v1121_v16 = vcombine.low %v1088_v35, %v1104_v23  ;;  %v1122_v53 = vcombine.high %v1088_v35, %v1104_v23 }
 0x509   : > { %v2075_v59 = vsub.f32 %v2009_v13, %v2069_v56 }
 0x50a   : > { %v1113_v24 = vrot.slane %v1105_v5, %v3658_v54  ;;  %v1120_v7 = vrot.slane %v1106_v14, %v3658_v54  ;;  %v1129_v44 = vrot.slane %v1121_v16, %v3658_v54  ;;  %v1136_v33 = vrot.slane %v1122_v53, %v3658_v54 }
 0x50b   : > { %v2081_v19 = vmul.f32 1.442695, %v2075_v59  ;;  %v2072_v8 = vpop.xlane.xlu0 %2071  ;;  %v1779_v57 = vpop.permute.xlu1 %1778 }
 0x50c   : > { %v1137_v10 = vcombine.high %v1113_v24, %v4493_v50  ;;  %v1138_v36 = vcombine.high %v1120_v7, %v4493_v50  ;;  %v2076_v45 = vsub.f32 %v4240_v60, %v2072_v8  ;;  %v1139_v40 = vcombine.high %v1129_v44, %v4493_v50 }
 0x50d   : > { %3014 = vpow2.f32 %v2081_v19  ;;  %v1140_v0 = vcombine.high %v1136_v33, %v4493_v50 }
 0x50e   : > { %v1797_v2 = vsel %vm1571_vm3, %v1137_v10, %v1775_v55  ;;  %v1799_v6 = vsel %vm1571_vm3, %v1138_v36, %v1779_v57  ;;  %v2083_v28 = vmul.f32 1.442695, %v2076_v45 }
 0x50f   : > { %v1812_v42 = vcombine.low %v1797_v2, %v1799_v6  ;;  %v1773_v13 = vpop.permute.xlu0 %1772  ;;  %v1783_v62 = vpop.permute.xlu1 %1782 }
 0x510   : > { %3016 = vpow2.f32 %v2083_v28  ;;  %v1796_v48 = vsel %vm1571_vm3, %v1113_v24, %v1773_v13  ;;  %v1801_v26 = vsel %vm1571_vm3, %v1139_v40, %v1783_v62 }
 0x511   : > { %v4274_v21 = vpop.eup %3010  ;;  %v1819_v52 = vrot.slane %v1812_v42, %v3641_v39 }
 0x512   : > { %v4276_v34 = vpop.eup %3012  ;;  %v2085_v4 = vsel %vm1571_vm3, %v4274_v21, 0.0 }
 0x513   : > { %v2088_v60 = vsel %vm1571_vm3, %v4276_v34, 0.0  ;;  %2086 = vadd.xlane.f32.xlu0 %v2085_v4  ;;  %v1777_v1 = vpop.permute.xlu0 %1776 }
 0x514   : > { %2089 = vadd.xlane.f32.xlu1 %v2088_v60  ;;  %v1798_v20 = vsel %vm1571_vm3, %v1120_v7, %v1777_v1 }
 0x515   : > { %v1804_v32 = vcombine.low %v1796_v48, %v1798_v20 }
 0x517   : > { %v1811_v25 = vrot.slane %v1804_v32, %v3641_v39  ;;  %v1781_v63 = vpop.permute.xlu0 %1780 }
 0x518   : > { %v1800_v41 = vsel %vm1571_vm3, %v1129_v44, %v1781_v63 }
 0x519   : > { %v1836_v12 = vcombine.low %v1811_v25, %v1819_v52  ;;  %v1837_v18 = vcombine.high %v1811_v25, %v1819_v52 }
 0x51a   : > { %v4286_v11 = vpop.eup %3014 }
 0x51b   : > { %v2091_v38 = vsel %vm1571_vm3, %v4286_v11, 0.0  ;;  %v1844_v56 = vrot.slane %v1836_v12, %v3658_v54  ;;  %v1851_v5 = vrot.slane %v1837_v18, %v3658_v54 }
 0x51c   : > { %2092 = vadd.xlane.f32.xlu0 %v2091_v38 }
 0x51d   : > { %v4290_v47 = vpop.eup %3016 }
 0x51e   : > { %v2094_v51 = vsel %vm1571_vm3, %v4290_v47, 0.0 }
 0x51f   : > { %2095 = vadd.xlane.f32.xlu1 %v2094_v51 }
 0x530   : > { %1786 = vrot.lane.b32.xlu1 %v1220_v31, %s3282_s14 }
 0x532   : > { %1784 = vrot.lane.b32.xlu0 %v1216_v27, %s3282_s14 }
 0x59c   : > { %v2087_v30 = vpop.xlane.xlu0 %2086 }
 0x59d   : > { %v2090_v58 = vpop.xlane.xlu1 %2089  ;;  %3018 = vrcp.f32 %v2087_v30 }
 0x59e   : > { %3020 = vrcp.f32 %v2090_v58 }
 0x5a5   : > { %v2093_v15 = vpop.xlane.xlu0 %2092 }
 0x5a6   : > { %3022 = vrcp.f32 %v2093_v15 }
 0x5a8   : > { %v2096_v37 = vpop.xlane.xlu1 %2095 }
 0x5a9   : > { %v1785_v43 = vpop.permute.xlu0 %1784  ;;  %3024 = vrcp.f32 %v2096_v37 }
 0x5aa   : > { %v1802_v61 = vsel %vm1571_vm3, %v1136_v33, %v1785_v43  ;;  %v3019_v23 = vpop.eup %3018 }
 0x5ab   : > { %v1820_v29 = vcombine.low %v1800_v41, %v1802_v61  ;;  %v3021_v16 = vpop.eup %3020  ;;  %v2101_v10 = vmul.f32 %v3019_v23, %v4274_v21 }
 0x5ac   : > { %v1787_v3 = vpop.permute.xlu1 %1786  ;;  %v2102_v36 = vmul.f32 %v3021_v16, %v4276_v34 }
 0x5ad   : > { %v1803_v46 = vsel %vm1571_vm3, %v1140_v0, %v1787_v3  ;;  %v1827_v49 = vrot.slane %v1820_v29, %v3641_v39  ;;  %v2105_v42 = vpack.c.bf16 %v2101_v10, %v2101_v10 }
 0x5ae   : > { %v1828_v17 = vcombine.low %v1801_v26, %v1803_v46  ;;  %v2106_v13 = vpack.c.bf16 %v2102_v36, %v2102_v36 }
 0x5b0   : > { %v1835_v9 = vrot.slane %v1828_v17, %v3641_v39 }
 0x5b2   : > { %v1852_v35 = vcombine.low %v1827_v49, %v1835_v9  ;;  %v1853_v22 = vcombine.high %v1827_v49, %v1835_v9 }
 0x5b3   : > { %v3023_v28 = vpop.eup %3022 }
 0x5b4   : > { %v1860_v55 = vrot.slane %v1852_v35, %v3658_v54  ;;  %v1867_v14 = vrot.slane %v1853_v22, %v3658_v54  ;;  %v2103_v60 = vmul.f32 %v3023_v28, %v4286_v11 }
 0x5b6   : > { %v1868_v53 = vcombine.low %v1844_v56, %v1860_v55  ;;  %v1869_v59 = vcombine.high %v1844_v56, %v1860_v55  ;;  %v1870_v24 = vcombine.low %v1851_v5, %v1867_v14  ;;  %v1871_v7 = vcombine.high %v1851_v5, %v1867_v14  ;;  %v3025_v4 = vpop.eup %3024 }
 0x5b7   : > { %v2104_v1 = vmul.f32 %v3025_v4, %v4290_v47  ;;  %v2107_v48 = vpack.c.bf16 %v2103_v60, %v2103_v60 }
 0x5b8   : > { %v1872_v19 = vpack.c.bf16 %v1868_v53, %v1868_v53  ;;  %v1873_v8 = vpack.c.bf16 %v1869_v59, %v1869_v59  ;;  %v1874_v2 = vpack.c.bf16 %v1870_v24, %v1870_v24  ;;  %v1875_v6 = vpack.c.bf16 %v1871_v7, %v1871_v7 }
 0x5b9   : > { %v2108_v20 = vpack.c.bf16 %v2104_v1, %v2104_v1 }
 0x5ba   : > { %v2114_v45 = vsel %vm2112_vm5, %v1872_v19, 0  ;;  %v2160_v57 = vsel %vm2112_vm5, %v1873_v8, 0  ;;  %v2206_v21 = vsel %vm2112_vm5, %v1874_v2, 0  ;;  %v2252_v34 = vsel %vm2112_vm5, %v1875_v6, 0 }
 0x5bb   : > { %2847 = vmatpush3.bf16.msra.mxu1 %v2114_v45  ;;  %2853 = vmatpush3.bf16.msra.mxu0 %v2160_v57 }
 0x5bc   : > { %2858 = vmatprep.subr.bf16.mxu1 %v4493_v50  ;;  %2864 = vmatprep.subr.bf16.mxu0 %v4493_v50 }
 0x5be   : > { %2849 = vmatmul.mubr.msk.bf16.vlgmr.msra.gmra.mxu1 %vm1571_vm3, %v2105_v42  ;;  %2855 = vmatmul.mubr.msk.bf16.vlgmr.msra.gmra.mxu0 %vm1571_vm3, %v2106_v13 }
 0x5bf   : > { %2859 = vmatpush3.bf16.msra.mxu1 %v2206_v21  ;;  %2865 = vmatpush3.bf16.msra.mxu0 %v2252_v34 }
 0x5c0   : > { %2860 = vmatprep.mubr.msk.bf16.mxu1 %vm3275_vm0, %v4493_v50  ;;  %2866 = vmatprep.mubr.msk.bf16.mxu0 %vm3275_vm0, %v4493_v50 }
 0x5c6   : > { %2861 = vmatmul.mubr.msk.bf16.vlgmr.msra.gmra.mxu1 %vm1571_vm3, %v2107_v48  ;;  %2867 = vmatmul.mubr.msk.bf16.vlgmr.msra.gmra.mxu0 %vm1571_vm3, %v2108_v20 }
 0x67e   : > { %v2150_v32 = vpop.f32.mrf.mxu1  ;;  %v2196_v52 = vpop.f32.mrf.mxu0 }
 0x680   : > { %v2850_v25 = vpop.f32.mrf.mxu1  ;;  %v2856_v12 = vpop.f32.mrf.mxu0 }
 0x682   : > { %v2153_v18 = vpop.f32.mrf.mxu1  ;;  %v2199_v38 = vpop.f32.mrf.mxu0 }
 0x684   : > { %v2851_v51 = vpop.f32.mrf.mxu1  ;;  %v2857_v27 = vpop.f32.mrf.mxu0 }
 0x686   : > { %v2242_v31 = vpop.f32.mrf.mxu1  ;;  %v2288_v63 = vpop.f32.mrf.mxu0 }
 0x687   : > { %v2294_v62 = vcombine.low %v2150_v32, %v2242_v31  ;;  %v2295_v11 = vcombine.high %v2150_v32, %v2242_v31  ;;  %v2310_v30 = vcombine.low %v2196_v52, %v2288_v63  ;;  %v2311_v47 = vcombine.high %v2196_v52, %v2288_v63 }
 0x688   : > { %v2862_v58 = vpop.f32.mrf.mxu1  ;;  %v2868_v15 = vpop.f32.mrf.mxu0 }
 0x689   : > { %v2302_v44 = vrot.slane %v2294_v62, %v3641_v39  ;;  %v2309_v33 = vrot.slane %v2295_v11, %v3641_v39  ;;  %v2318_v37 = vrot.slane %v2310_v30, %v3641_v39  ;;  %v2325_v43 = vrot.slane %v2311_v47, %v3641_v39 }
 0x68a   : > { %v2245_v41 = vpop.f32.mrf.mxu1  ;;  %v2291_v61 = vpop.f32.mrf.mxu0 }
 0x68b   : > { %v2326_v40 = vcombine.low %v2302_v44, %v2318_v37  ;;  %v2327_v29 = vcombine.high %v2302_v44, %v2318_v37  ;;  %v2342_v0 = vcombine.low %v2309_v33, %v2325_v43  ;;  %v2343_v3 = vcombine.high %v2309_v33, %v2325_v43 }
 0x68c   : > { %v2863_v26 = vpop.f32.mrf.mxu1  ;;  %v2869_v46 = vpop.f32.mrf.mxu0 }
 0x68d   : > { %v2334_v17 = vrot.slane %v2326_v40, %v3658_v54  ;;  %v2341_v49 = vrot.slane %v2327_v29, %v3658_v54  ;;  %v2350_v9 = vrot.slane %v2342_v0, %v3658_v54  ;;  %v2357_v35 = vrot.slane %v2343_v3, %v3658_v54 }
 0x68f   : > { %2454 = vrot.lane.b32.xlu0 %v2334_v17, %s3277_s17  ;;  %v2358_v22 = vcombine.high %v2334_v17, %v4493_v50  ;;  %v2362_v23 = vcombine.low %v2334_v17, %v2341_v49  ;;  %v2767_v56 = vcombine.high %v2334_v17, %v2341_v49  ;;  %v2378_v55 = vcombine.low %v2350_v9, %v2357_v35 }
 0x690   : > { %v2768_v5 = vcombine.high %v2350_v9, %v2357_v35  ;;  %v2359_v24 = vcombine.high %v2341_v49, %v4493_v50  ;;  %v2360_v6 = vcombine.high %v2350_v9, %v4493_v50  ;;  %v2361_v21 = vcombine.high %v2357_v35, %v4493_v50 }
 0x691   : > { %2456 = vrot.lane.b32.xlu1 %v2358_v22, %s3277_s17  ;;  %v2369_v14 = vrot.slane %v2362_v23, %v3641_v39  ;;  %v2377_v16 = vrot.slane %v2767_v56, %v3641_v39  ;;  %v2385_v53 = vrot.slane %v2378_v55, %v3641_v39 }
 0x692   : > { %v2393_v59 = vrot.slane %v2768_v5, %v3641_v39 }
 0x693   : > { %2458 = vrot.lane.b32.xlu0 %v2341_v49, %s3277_s17  ;;  %v2394_v7 = vcombine.low %v2369_v14, %v2377_v16  ;;  %v2395_v8 = vcombine.high %v2369_v14, %v2377_v16 }
 0x694   : > { %v2410_v19 = vcombine.low %v2385_v53, %v2393_v59  ;;  %v2411_v10 = vcombine.high %v2385_v53, %v2393_v59 }
 0x695   : > { %2460 = vrot.lane.b32.xlu1 %v2359_v24, %s3277_s17  ;;  %v2402_v36 = vrot.slane %v2394_v7, %v3658_v54  ;;  %v2409_v57 = vrot.slane %v2395_v8, %v3658_v54 }
 0x696   : > { %v2418_v45 = vrot.slane %v2410_v19, %v3658_v54  ;;  %v2425_v2 = vrot.slane %v2411_v10, %v3658_v54 }
 0x697   : > { %2462 = vrot.lane.b32.xlu0 %v2350_v9, %s3277_s17 }
 0x698   : > { %v2427_v28 = vcombine.high %v2402_v36, %v2418_v45  ;;  %v2429_v42 = vcombine.high %v2409_v57, %v2425_v2  ;;  %v2428_v13 = vcombine.low %v2409_v57, %v2425_v2  ;;  %v2426_v4 = vcombine.low %v2402_v36, %v2418_v45 }
 0x699   : > { %2464 = vrot.lane.b32.xlu1 %v2360_v6, %s3277_s17 }
 0x69b   : > { %2466 = vrot.lane.b32.xlu0 %v2357_v35, %s3277_s17 }
 0x69d   : > { %2468 = vrot.lane.b32.xlu1 %v2361_v21, %s3277_s17  ;;  %s3286_s17 = smov 32  }
 0x701   : > { %v2455_v34 = vpop.permute.xlu0 %2454 }
 0x703   : > { %v2457_v60 = vpop.permute.xlu1 %2456 }
 0x705   : > { %v2459_v1 = vpop.permute.xlu0 %2458 }
 0x706   : > { %v2478_v25 = vcombine.low %v2455_v34, %v2459_v1 }
 0x707   : > { %v2461_v48 = vpop.permute.xlu1 %2460 }
 0x708   : > { %v2486_v32 = vcombine.low %v2457_v60, %v2461_v48  ;;  %v2485_v27 = vrot.slane %v2478_v25, %v3641_v39 }
 0x709   : > { %v2463_v20 = vpop.permute.xlu0 %2462 }
 0x70a   : > { %v2493_v18 = vrot.slane %v2486_v32, %v3641_v39 }
 0x70b   : > { %v2465_v52 = vpop.permute.xlu1 %2464 }
 0x70c   : > { %v2510_v63 = vcombine.low %v2485_v27, %v2493_v18  ;;  %v2511_v50 = vcombine.high %v2485_v27, %v2493_v18 }
 0x70d   : > { %v2467_v12 = vpop.permute.xlu0 %2466 }
 0x70e   : > { %v2494_v38 = vcombine.low %v2463_v20, %v2467_v12  ;;  %v2525_v58 = vrot.slane %v2511_v50, %v3658_v54  ;;  %v2518_v44 = vrot.slane %v2510_v63, %v3658_v54 }
 0x70f   : > { %v2469_v51 = vpop.permute.xlu1 %2468 }
 0x710   : > { %v2502_v31 = vcombine.low %v2465_v52, %v2469_v51  ;;  %v2501_v62 = vrot.slane %v2494_v38, %v3641_v39 }
 0x712   : > { %v2509_v11 = vrot.slane %v2502_v31, %v3641_v39 }
 0x714   : > { %v2526_v30 = vcombine.low %v2501_v62, %v2509_v11  ;;  %v2527_v47 = vcombine.high %v2501_v62, %v2509_v11 }
 0x716   : > { %v2541_v15 = vrot.slane %v2527_v47, %v3658_v54  ;;  %v2534_v33 = vrot.slane %v2526_v30, %v3658_v54 }
 0x718   : > { %v2544_v37 = vcombine.low %v2525_v58, %v2541_v15  ;;  %v2543_v43 = vcombine.high %v2518_v44, %v2534_v33  ;;  %v2542_v41 = vcombine.low %v2518_v44, %v2534_v33  ;;  %v2545_v61 = vcombine.high %v2525_v58, %v2541_v15 }
 0x71a   : > { %2551 = vrot.lane.b32.xlu1 %v2544_v37, %s3284_s1  ;;  %2547 = vrot.lane.b32.xlu0 %v2543_v43, %s3282_s14 }
 0x71e   : > { %2431 = vrot.lane.b32.xlu1 %v2427_v28, %s3282_s14  ;;  %2555 = vrot.lane.b32.xlu0 %v2545_v61, %s3285_s19  ;;  %s2569_s14 = scalar_lea.sflag [#allocation4], %s3557_s18 }
 0x722   : > { %2439 = vrot.lane.b32.xlu1 %v2429_v42, %s3285_s19  ;;  %2435 = vrot.lane.b32.xlu0 %v2428_v13, %s3284_s1 }
 0x78c   : > { %v2552_v39 = vpop.permute.xlu1 %2551  ;;  %v2548_v40 = vpop.permute.xlu0 %2547 }
 0x78d   : > { %v2558_v54 = vsel %vm1571_vm3, %v2542_v41, %v2548_v40 }
 0x78e   : > { %v2559_v3 = vsel %vm1876_vm4, %v2558_v54, %v2552_v39 }
 0x790   : > { %v2432_v29 = vpop.permute.xlu1 %2431  ;;  %v2556_v0 = vpop.permute.xlu0 %2555 }
 0x791   : > { %v2560_v26 = vsel %vm2444_vm6, %v2559_v3, %v2556_v0  ;;  %v2442_v46 = vsel %vm1571_vm3, %v2426_v4, %v2432_v29 }
 0x792   : > { %2562 = vrot.lane.b32.xlu0 %v2560_v26, %s3286_s17 }
 0x794   : > { %v2440_v17 = vpop.permute.xlu1 %2439  ;;  %v2436_v49 = vpop.permute.xlu0 %2435 }
 0x795   : > { %v2443_v9 = vsel %vm1876_vm4, %v2442_v46, %v2436_v49 }
 0x796   : > { %v2445_v35 = vsel %vm2444_vm6, %v2443_v9, %v2440_v17 }
 0x804   : > { %v2563_v22 = vpop.permute.xlu0 %2562 }
 0x805   : > { %v2565_v23 = vsel %vm564_vm1, %v2445_v35, %v2563_v22 }
 0x806   : > { %2567 = vst.msk [vmem:[%s543_s24] sm:$0xff] %vm2566_vm7, %v2565_v23 }
 0x807   : > { %3201 = shalt.err (!%p3198_p11)
}
 0x808   : > { %s3202_s29 = scalar_lea.hbm %s4380_s16, 128  ;;  %s3206_s30 = scalar_lea.hbm %s4495_s26, 256 }
 0x809   : > { %p3203_p5 = scmp.ne.s32.totalorder %s4380_s16, %s3202_s29  ;;  %p3207_p2 = scmp.lt.s32.totalorder %s4380_s16, %s4495_s26 }
 0x80a   : > { %p3208_p13 = scmp.lt.s32.totalorder %s3206_s30, %s3202_s29 }
 0x80b   : > { %p3204_p10 = pnand %p3203_p5, %p4496_p7 }
 0x80c   : > { %p3209_p1 = por %p3208_p13, %p3207_p2 }
 0x80d   : > { %p3205_p9 = pneg %p3204_p10 }
 0x80f   : > { %p3210_p12 = pnand %p3209_p1, %p3205_p9 }
 0x811   : > { %3213 = shalt.err (!%p3210_p12)
}
 0x812   : > { %2888 = dma.vmem_to_hbm [thread:$0]  (%p4496_p7), %s2583_s21, 128, %s4380_s16, %s2569_s14  }
 0x813 PF: > { %s4497_s19 = sld [smem:[#allocation19_spill]] }
 0x814   : > { %s4498_s17 = sld [smem:[#allocation21_spill]] }
 0x815   : > { %s4499_s10 = sld [smem:[#allocation20_spill]] }
 0x819   : > { %s2594_s3 = sand.u32 1, %s4497_s19  }
 0x81a   : > { %p4500_p0 = scmp.ne.s32.totalorder %s4498_s17, 0  ;;  %s2595_s24 = scalar_lea.sflag [#allocation4], %s2594_s3 }
 0x81b   : > { %p4501_p3 = scmp.ge.s32.totalorder %s4499_s10, 2 }
 0x81d   : > { %p2911_p6 = pnand %p4501_p3, %p4500_p0 }
 0x81f   : > { %p2912_p4 = pneg %p2911_p6 }
 0x821   : > { %3247 = dma.done.wait (%p2912_p4), %s2595_s24, 128  }
 0x822   : > { %3249 = vsyncadd (%p2912_p4), %s2595_s24, 4294967168  ;;  %s4502_s24 = sld [smem:[#allocation22_spill]]  ;;  %s4504_s21 = smov %s3256_s22 }
 0x823   : > { %s4503_s12 = sld [smem:[#allocation23_spill]]  ;;  %s4505_s22 = smov %s3260_s23 }
 0x828   : > { %p30_p8 = scmp.ge.s32.totalorder %s4502_s24, 4  }
 0x829   : > { %s4506_s23 = smov %s4503_s12 }
 0x82a   :  { %32 = sbr.rel (!%p30_p8) target bundleno = 16 (0x10), region = 149 }
 0x82f   :  { %2600 = vsyncpa [#allocation3], 1 }
 0x830   :  { %2602 = vsyncpa [#allocation3 + $0x1], 1 }
 0x831   :  { %2603 = vsyncpa [#allocation6], 1 }
 0x832   :  { %2605 = vsyncpa [#allocation6 + $0x1], 1 }
 0x833   :  { %2606 = vsyncpa [#allocation9], 1 }
 0x834   :  { %2607 = vsyncpa [#allocation12], 1 }
 0x835   :  { %2608 = vsyncpa [#allocation4], 1 }
 0x836   :  { %2610 = vsyncpa [#allocation4 + $0x1], 1 }

</bundles_post_ra>
